<compile_context>
chip_gen: v7x
topology: tpu7x:2x2x1
jax: 0.10.0
libtpu: 0.0.40
codegen_flags: <defaults>
</compile_context>

<pallas_src>
import jax
import jax.numpy as jnp
from jax import lax
from jax.experimental import pallas as pl
from jax.experimental.pallas import tpu as pltpu


# ----------------------------------------------------------------------------
# Fused Pallas kernel (whole model: all LSTM layers, both directions, head)
# ----------------------------------------------------------------------------

def _make_disc_kernel(num_layers, T, Bp, H):
    H2, H6 = 2 * H, 6 * H

    def kernel(*args):
        # refs: x_big, per-layer (wih_big, b_big, whh_big), head (w1,b1,w2,b2), out
        x_ref = args[0]
        idx = 1
        layer_refs = []
        for _ in range(num_layers):
            layer_refs.append(args[idx:idx + 3])
            idx += 3
        w1_ref, b1_ref, w2_ref, b2_ref = args[idx:idx + 4]
        out_ref = args[idx + 4]

        # Layer-0 doubled input: row block t = [x(t) | x(T-1-t)]  (time-major, B padded)
        layer_in = x_ref[...].astype(jnp.float32)
        h = jnp.zeros((Bp, H2), jnp.float32)

        for l in range(num_layers):
            wih_ref, b_ref, whh_ref = layer_refs[l]
            last = (l == num_layers - 1)

            # Hoisted input projection for BOTH directions (one MXU GEMM per layer).
            # Column layout: [i_f,i_b, f_f,f_b, o_f,o_b, g_f,g_b]; row block t already
            # holds fwd gates from x(t) and bwd gates from x(T-1-t) (bias folded in).
            gx = (jnp.dot(layer_in, wih_ref[...],
                          preferred_element_type=jnp.float32) + b_ref[...])
            whh = whh_ref[...]                       # block-diag (2H, 8H), hoisted

            h = jnp.zeros((Bp, H2), jnp.float32)     # [h_fwd | h_bwd]
            c = jnp.zeros((Bp, H2), jnp.float32)     # [c_fwd | c_bwd]
            hs = []
            # Fully unrolled static-T time loop: per step exactly ONE recurrent matmul,
            # ONE 6H-wide sigmoid, two 2H-wide tanh, fused 2H-wide VPU updates.
            for t in range(T):
                g = gx[t * Bp:(t + 1) * Bp, :] + jnp.dot(
                    h, whh, preferred_element_type=jnp.float32)
                s = jax.nn.sigmoid(g[:, :H6])        # [i_f,i_b, f_f,f_b, o_f,o_b]
                gg = jnp.tanh(g[:, H6:])             # [g_f, g_b]
                c = s[:, H2:2 * H2] * c + s[:, :H2] * gg
                h = s[:, 2 * H2:3 * H2] * jnp.tanh(c)
                if not last:
                    hs.append(h)                     # traced value, no VMEM store

            if not last:
                # Next layer's doubled input, assembled in bulk after the loop:
                # row block t = [h_cat(t) | h_cat(T-1-t)]
                #            = [h_f(t), h_b(T-1-t), h_f(T-1-t), h_b(t)]
                # (the matching row permutation is baked into the next layer's W_ih).
                rows = [jnp.concatenate([hs[t], hs[T - 1 - t]], axis=-1)
                        for t in range(T)]
                layer_in = jnp.concatenate(rows, axis=0)   # (T*Bp, 4H)

        # ---- classification head on final hidden states of the LAST layer ----
        # h == [h_f(T-1) | h_b(after step 0)] == torch.cat((h_n[0], h_n[1]), dim=1)
        z = jnp.dot(h, w1_ref[...], preferred_element_type=jnp.float32) + b1_ref[...]
        z = jnp.where(z >= 0.0, z, 0.2 * z)          # LeakyReLU(0.2); Dropout = id (eval)
        out_ref[...] = (jnp.dot(z, w2_ref[...],
                                preferred_element_type=jnp.float32) + b2_ref[...])

    return kernel


# ----------------------------------------------------------------------------
# Wrapper
# ----------------------------------------------------------------------------

def stroke_sequence_discriminator(x, packed):
    """x: (batch, seq_len, input_dim) -> logits: (batch, 1)."""
    B, T, D = x.shape
    H = packed["lstm"][0]["whh_big"].shape[0] // 2
    num_layers = len(packed["lstm"])

    # Pad batch to the 8-sublane granule so all row-block slices are tile-aligned.
    Bp = max(8, ((B + 7) // 8) * 8)
    x_tm = jnp.transpose(x, (1, 0, 2)).astype(jnp.float32)        # (T, B, D)
    if Bp > B:
        x_tm = jnp.concatenate(
            [x_tm, jnp.zeros((T, Bp - B, D), jnp.float32)], axis=1)
    # Doubled layer-0 input: row t = [x(t) | x(T-1-t)]; flattened time-major rows.
    x_big = jnp.concatenate([x_tm, x_tm[::-1]], axis=-1)          # (T, Bp, 2D)
    x_flat = x_big.reshape(T * Bp, 2 * D)

    inputs = [x_flat]
    for lp in packed["lstm"]:
        inputs += [lp["wih_big"], lp["b_big"], lp["whh_big"]]
    hp = packed["head"]
    inputs += [hp["w1"], hp["b1"], hp["w2"], hp["b2"]]

    kernel = _make_disc_kernel(num_layers, T, Bp, H)
    out = pl.pallas_call(
        kernel,
        out_shape=jax.ShapeDtypeStruct((Bp, 1), jnp.float32),
        compiler_params=pltpu.CompilerParams(vmem_limit_bytes=32 * 1024 * 1024),
    )(*inputs)
    return out[:B]


# ----------------------------------------------------------------------------
# Canonical (PyTorch-layout) parameter init + host-side packing into the fused
# layout the kernel consumes (gate-type-grouped columns, block-diag weights).
# ----------------------------------------------------------------------------

def init_params(key, input_dim, hidden_dim, num_layers):
    """Canonical per-direction weights, transposed, gate order [i|f|g|o]."""
    H = hidden_dim
    bound = 1.0 / float(H) ** 0.5

    def uni(k, shape):
        return jax.random.uniform(k, shape, jnp.float32, -bound, bound)

    layers = []
    for l in range(num_layers):
        d_in = input_dim if l == 0 else 2 * H
        key, *ks = jax.random.split(key, 9)
        layers.append({
            "wih_f": uni(ks[0], (d_in, 4 * H)),
            "whh_f": uni(ks[1], (H, 4 * H)),
            "b_f": uni(ks[2], (1, 4 * H)) + uni(ks[3], (1, 4 * H)),   # b_ih + b_hh
            "wih_b": uni(ks[4], (d_in, 4 * H)),
            "whh_b": uni(ks[5], (H, 4 * H)),
            "b_b": uni(ks[6], (1, 4 * H)) + uni(ks[7], (1, 4 * H)),
        })
    key, k1, k2, k3, k4 = jax.random.split(key, 5)
    head = {"w1": uni(k1, (2 * H, H // 2)), "b1": uni(k2, (1, H // 2)),
            "w2": uni(k3, (H // 2, 1)), "b2": uni(k4, (1, 1))}
    return {"lstm": layers, "head": head}


def _grouped_cols(wf, wb, H):
    """[i|f|g|o] per direction -> grouped [i_f,i_b, f_f,f_b, o_f,o_b, g_f,g_b]."""
    def split4(w):
        return (w[..., 0:H], w[..., H:2 * H], w[..., 2 * H:3 * H], w[..., 3 * H:4 * H])
    i_f, f_f, g_f, o_f = split4(wf)
    i_b, f_b, g_b, o_b = split4(wb)
    return jnp.concatenate([i_f, i_b, f_f, f_b, o_f, o_b, g_f, g_b], axis=-1)


def pack_params(canon, input_dim, hidden_dim):
    H = hidden_dim
    packed = {"lstm": [], "head": canon["head"]}
    zH = jnp.zeros((H, 4 * H), jnp.float32)
    for l, lp in enumerate(canon["lstm"]):
        # Block-diagonal recurrent weight: rows 0:H (h_f) feed fwd gate columns,
        # rows H:2H (h_b) feed bwd gate columns.
        whh_big = _grouped_cols(jnp.concatenate([lp["whh_f"], zH], axis=0),
                                jnp.concatenate([zH, lp["whh_b"]], axis=0), H)
        if l == 0:
            d_in = input_dim
            zD = jnp.zeros((d_in, 4 * H), jnp.float32)
            wf_rows = jnp.concatenate([lp["wih_f"], zD], axis=0)   # rows: x(t)
            wb_rows = jnp.concatenate([zD, lp["wih_b"]], axis=0)   # rows: x(T-1-t)
        else:
            # Doubled-input row layout: [h_f(t), h_b(T-1-t), h_f(T-1-t), h_b(t)]
            wf_rows = jnp.concatenate(
                [lp["wih_f"][0:H], zH, zH, lp["wih_f"][H:2 * H]], axis=0)
            wb_rows = jnp.concatenate(
                [zH, lp["wih_b"][H:2 * H], lp["wih_b"][0:H], zH], axis=0)
        packed["lstm"].append({
            "wih_big": _grouped_cols(wf_rows, wb_rows, H),          # (2*d_in, 8H)
            "b_big": _grouped_cols(lp["b_f"], lp["b_b"], H),        # (1, 8H)
            "whh_big": whh_big,                                     # (2H, 8H)
        })
    return packed


# ----------------------------------------------------------------------------
# Pure-JAX reference (canonical PyTorch semantics) for numerical validation
# ----------------------------------------------------------------------------

def _reference(x, canon):
    def lstm_dir(seq, wih, whh, b, reverse):
        H = whh.shape[0]
        if reverse:
            seq = seq[::-1]

        def step(carry, x_t):
            h, c = carry
            gates = x_t @ wih + h @ whh + b[0]
            i = jax.nn.sigmoid(gates[:, 0:H])
            f = jax.nn.sigmoid(gates[:, H:2 * H])
            g = jnp.tanh(gates[:, 2 * H:3 * H])
            o = jax.nn.sigmoid(gates[:, 3 * H:4 * H])
            c = f * c + i * g
            h = o * jnp.tanh(c)
            return (h, c), h

        Bsz = seq.shape[1]
        init = (jnp.zeros((Bsz, H), jnp.float32), jnp.zeros((Bsz, H), jnp.float32))
        (h, _), ys = lax.scan(step, init, seq)
        if reverse:
            ys = ys[::-1]
        return ys, h

    x_tm = jnp.transpose(x, (1, 0, 2)).astype(jnp.float32)
    layer_in = x_tm
    h_f = h_b = None
    for lp in canon["lstm"]:
        ys_f, h_f = lstm_dir(layer_in, lp["wih_f"], lp["whh_f"], lp["b_f"], False)
        ys_b, h_b = lstm_dir(layer_in, lp["wih_b"], lp["whh_b"], lp["b_b"], True)
        layer_in = jnp.concatenate([ys_f, ys_b], axis=-1)
    rep = jnp.concatenate([h_f, h_b], axis=-1)
    hp = canon["head"]
    z = rep @ hp["w1"] + hp["b1"]
    z = jnp.where(z >= 0, z, 0.2 * z)
    return z @ hp["w2"] + hp["b2"]


if __name__ == "__main__":
    batch, seq_len = 2, 8
    input_dim, hidden_dim, num_layers = 4, 32, 2

    key = jax.random.PRNGKey(0)
    key, kx, kp = jax.random.split(key, 3)
    x = jax.random.normal(kx, (batch, seq_len, input_dim), jnp.float32)
    canon = init_params(kp, input_dim, hidden_dim, num_layers)
    packed = pack_params(canon, input_dim, hidden_dim)

    logits = jax.block_until_ready(stroke_sequence_discriminator(x, packed))
    assert logits.shape == (batch, 1), logits.shape

    ref = jax.block_until_ready(_reference(x, canon))
    assert jnp.max(jnp.abs(logits - ref)) < 1e-3, (logits, ref)

    print("KERNEL_OK")
</pallas_src>

<mosaic_0001>
module attributes {stable_mosaic.version = 11 : i64} {
  func.func @kernel(%arg0: memref<64x8xf32, #tpu.memory_space<vmem>>, %arg1: memref<8x256xf32, #tpu.memory_space<vmem>>, %arg2: memref<1x256xf32, #tpu.memory_space<vmem>>, %arg3: memref<64x256xf32, #tpu.memory_space<vmem>>, %arg4: memref<128x256xf32, #tpu.memory_space<vmem>>, %arg5: memref<1x256xf32, #tpu.memory_space<vmem>>, %arg6: memref<64x256xf32, #tpu.memory_space<vmem>>, %arg7: memref<64x16xf32, #tpu.memory_space<vmem>>, %arg8: memref<1x16xf32, #tpu.memory_space<vmem>>, %arg9: memref<16x1xf32, #tpu.memory_space<vmem>>, %arg10: memref<1x1xf32, #tpu.memory_space<vmem>>, %arg11: memref<8x1xf32, #tpu.memory_space<vmem>>) attributes {dimension_semantics = [], scalar_prefetch = 0 : i64, scratch_operands = 0 : i64, tpu.core_type = #tpu.core_type<tc>} {
    %c0 = arith.constant 0 : index
    %c0_0 = arith.constant 0 : index
    %0 = vector.load %arg0[%c0, %c0_0] : memref<64x8xf32, #tpu.memory_space<vmem>>, vector<64x8xf32>
    %c0_1 = arith.constant 0 : index
    %c0_2 = arith.constant 0 : index
    %1 = vector.load %arg1[%c0_1, %c0_2] : memref<8x256xf32, #tpu.memory_space<vmem>>, vector<8x256xf32>
    %cst = arith.constant dense<0.000000e+00> : vector<64x256xf32>
    %2 = tpu.matmul %0, %1, %cst {dimension_numbers = #tpu.dot_dimension_numbers<[1], [0], [0], [1], [0, 0, 1, 1], [], []>} : vector<64x8xf32>, vector<8x256xf32>, vector<64x256xf32> -> vector<64x256xf32>
    %c0_3 = arith.constant 0 : index
    %c0_4 = arith.constant 0 : index
    %3 = vector.load %arg2[%c0_3, %c0_4] : memref<1x256xf32, #tpu.memory_space<vmem>>, vector<1x256xf32>
    %4 = vector.broadcast %3 : vector<1x256xf32> to vector<64x256xf32>
    %5 = arith.addf %2, %4 : vector<64x256xf32>
    %c0_5 = arith.constant 0 : index
    %c0_6 = arith.constant 0 : index
    %6 = vector.load %arg3[%c0_5, %c0_6] : memref<64x256xf32, #tpu.memory_space<vmem>>, vector<64x256xf32>
    %cst_7 = arith.constant 0.000000e+00 : f32
    %7 = vector.broadcast %cst_7 : f32 to vector<8x64xf32>
    %cst_8 = arith.constant 0.000000e+00 : f32
    %8 = vector.broadcast %cst_8 : f32 to vector<8x64xf32>
    %9 = vector.extract_strided_slice %5 {offsets = [0, 0], sizes = [8, 256], strides = [1, 1]} : vector<64x256xf32> to vector<8x256xf32>
    %cst_9 = arith.constant dense<0.000000e+00> : vector<8x256xf32>
    %10 = tpu.matmul %7, %6, %cst_9 {dimension_numbers = #tpu.dot_dimension_numbers<[1], [0], [0], [1], [0, 0, 1, 1], [], []>} : vector<8x64xf32>, vector<64x256xf32>, vector<8x256xf32> -> vector<8x256xf32>
    %11 = arith.addf %9, %10 : vector<8x256xf32>
    %12 = vector.extract_strided_slice %11 {offsets = [0, 0], sizes = [8, 192], strides = [1, 1]} : vector<8x256xf32> to vector<8x192xf32>
    %13 = arith.negf %12 : vector<8x192xf32>
    %14 = math.exp %13 : vector<8x192xf32>
    %cst_10 = arith.constant 1.000000e+00 : f32
    %15 = vector.broadcast %cst_10 : f32 to vector<8x192xf32>
    %16 = arith.addf %15, %14 : vector<8x192xf32>
    %17 = arith.divf %15, %16 : vector<8x192xf32>
    %18 = vector.extract_strided_slice %11 {offsets = [0, 192], sizes = [8, 64], strides = [1, 1]} : vector<8x256xf32> to vector<8x64xf32>
    %19 = math.tanh %18 : vector<8x64xf32>
    %20 = vector.extract_strided_slice %17 {offsets = [0, 64], sizes = [8, 64], strides = [1, 1]} : vector<8x192xf32> to vector<8x64xf32>
    %21 = arith.mulf %20, %8 : vector<8x64xf32>
    %22 = vector.extract_strided_slice %17 {offsets = [0, 0], sizes = [8, 64], strides = [1, 1]} : vector<8x192xf32> to vector<8x64xf32>
    %23 = arith.mulf %22, %19 : vector<8x64xf32>
    %24 = arith.addf %21, %23 : vector<8x64xf32>
    %25 = vector.extract_strided_slice %17 {offsets = [0, 128], sizes = [8, 64], strides = [1, 1]} : vector<8x192xf32> to vector<8x64xf32>
    %26 = math.tanh %24 : vector<8x64xf32>
    %27 = arith.mulf %25, %26 : vector<8x64xf32>
    %28 = vector.extract_strided_slice %5 {offsets = [8, 0], sizes = [8, 256], strides = [1, 1]} : vector<64x256xf32> to vector<8x256xf32>
    %cst_11 = arith.constant dense<0.000000e+00> : vector<8x256xf32>
    %29 = tpu.matmul %27, %6, %cst_11 {dimension_numbers = #tpu.dot_dimension_numbers<[1], [0], [0], [1], [0, 0, 1, 1], [], []>} : vector<8x64xf32>, vector<64x256xf32>, vector<8x256xf32> -> vector<8x256xf32>
    %30 = arith.addf %28, %29 : vector<8x256xf32>
    %31 = vector.extract_strided_slice %30 {offsets = [0, 0], sizes = [8, 192], strides = [1, 1]} : vector<8x256xf32> to vector<8x192xf32>
    %32 = arith.negf %31 : vector<8x192xf32>
    %33 = math.exp %32 : vector<8x192xf32>
    %cst_12 = arith.constant 1.000000e+00 : f32
    %34 = vector.broadcast %cst_12 : f32 to vector<8x192xf32>
    %35 = arith.addf %34, %33 : vector<8x192xf32>
    %36 = arith.divf %34, %35 : vector<8x192xf32>
    %37 = vector.extract_strided_slice %30 {offsets = [0, 192], sizes = [8, 64], strides = [1, 1]} : vector<8x256xf32> to vector<8x64xf32>
    %38 = math.tanh %37 : vector<8x64xf32>
    %39 = vector.extract_strided_slice %36 {offsets = [0, 64], sizes = [8, 64], strides = [1, 1]} : vector<8x192xf32> to vector<8x64xf32>
    %40 = arith.mulf %39, %24 : vector<8x64xf32>
    %41 = vector.extract_strided_slice %36 {offsets = [0, 0], sizes = [8, 64], strides = [1, 1]} : vector<8x192xf32> to vector<8x64xf32>
    %42 = arith.mulf %41, %38 : vector<8x64xf32>
    %43 = arith.addf %40, %42 : vector<8x64xf32>
    %44 = vector.extract_strided_slice %36 {offsets = [0, 128], sizes = [8, 64], strides = [1, 1]} : vector<8x192xf32> to vector<8x64xf32>
    %45 = math.tanh %43 : vector<8x64xf32>
    %46 = arith.mulf %44, %45 : vector<8x64xf32>
    %47 = vector.extract_strided_slice %5 {offsets = [16, 0], sizes = [8, 256], strides = [1, 1]} : vector<64x256xf32> to vector<8x256xf32>
    %cst_13 = arith.constant dense<0.000000e+00> : vector<8x256xf32>
    %48 = tpu.matmul %46, %6, %cst_13 {dimension_numbers = #tpu.dot_dimension_numbers<[1], [0], [0], [1], [0, 0, 1, 1], [], []>} : vector<8x64xf32>, vector<64x256xf32>, vector<8x256xf32> -> vector<8x256xf32>
    %49 = arith.addf %47, %48 : vector<8x256xf32>
    %50 = vector.extract_strided_slice %49 {offsets = [0, 0], sizes = [8, 192], strides = [1, 1]} : vector<8x256xf32> to vector<8x192xf32>
    %51 = arith.negf %50 : vector<8x192xf32>
    %52 = math.exp %51 : vector<8x192xf32>
    %cst_14 = arith.constant 1.000000e+00 : f32
    %53 = vector.broadcast %cst_14 : f32 to vector<8x192xf32>
    %54 = arith.addf %53, %52 : vector<8x192xf32>
    %55 = arith.divf %53, %54 : vector<8x192xf32>
    %56 = vector.extract_strided_slice %49 {offsets = [0, 192], sizes = [8, 64], strides = [1, 1]} : vector<8x256xf32> to vector<8x64xf32>
    %57 = math.tanh %56 : vector<8x64xf32>
    %58 = vector.extract_strided_slice %55 {offsets = [0, 64], sizes = [8, 64], strides = [1, 1]} : vector<8x192xf32> to vector<8x64xf32>
    %59 = arith.mulf %58, %43 : vector<8x64xf32>
    %60 = vector.extract_strided_slice %55 {offsets = [0, 0], sizes = [8, 64], strides = [1, 1]} : vector<8x192xf32> to vector<8x64xf32>
    %61 = arith.mulf %60, %57 : vector<8x64xf32>
    %62 = arith.addf %59, %61 : vector<8x64xf32>
    %63 = vector.extract_strided_slice %55 {offsets = [0, 128], sizes = [8, 64], strides = [1, 1]} : vector<8x192xf32> to vector<8x64xf32>
    %64 = math.tanh %62 : vector<8x64xf32>
    %65 = arith.mulf %63, %64 : vector<8x64xf32>
    %66 = vector.extract_strided_slice %5 {offsets = [24, 0], sizes = [8, 256], strides = [1, 1]} : vector<64x256xf32> to vector<8x256xf32>
    %cst_15 = arith.constant dense<0.000000e+00> : vector<8x256xf32>
    %67 = tpu.matmul %65, %6, %cst_15 {dimension_numbers = #tpu.dot_dimension_numbers<[1], [0], [0], [1], [0, 0, 1, 1], [], []>} : vector<8x64xf32>, vector<64x256xf32>, vector<8x256xf32> -> vector<8x256xf32>
    %68 = arith.addf %66, %67 : vector<8x256xf32>
    %69 = vector.extract_strided_slice %68 {offsets = [0, 0], sizes = [8, 192], strides = [1, 1]} : vector<8x256xf32> to vector<8x192xf32>
    %70 = arith.negf %69 : vector<8x192xf32>
    %71 = math.exp %70 : vector<8x192xf32>
    %cst_16 = arith.constant 1.000000e+00 : f32
    %72 = vector.broadcast %cst_16 : f32 to vector<8x192xf32>
    %73 = arith.addf %72, %71 : vector<8x192xf32>
    %74 = arith.divf %72, %73 : vector<8x192xf32>
    %75 = vector.extract_strided_slice %68 {offsets = [0, 192], sizes = [8, 64], strides = [1, 1]} : vector<8x256xf32> to vector<8x64xf32>
    %76 = math.tanh %75 : vector<8x64xf32>
    %77 = vector.extract_strided_slice %74 {offsets = [0, 64], sizes = [8, 64], strides = [1, 1]} : vector<8x192xf32> to vector<8x64xf32>
    %78 = arith.mulf %77, %62 : vector<8x64xf32>
    %79 = vector.extract_strided_slice %74 {offsets = [0, 0], sizes = [8, 64], strides = [1, 1]} : vector<8x192xf32> to vector<8x64xf32>
    %80 = arith.mulf %79, %76 : vector<8x64xf32>
    %81 = arith.addf %78, %80 : vector<8x64xf32>
    %82 = vector.extract_strided_slice %74 {offsets = [0, 128], sizes = [8, 64], strides = [1, 1]} : vector<8x192xf32> to vector<8x64xf32>
    %83 = math.tanh %81 : vector<8x64xf32>
    %84 = arith.mulf %82, %83 : vector<8x64xf32>
    %85 = vector.extract_strided_slice %5 {offsets = [32, 0], sizes = [8, 256], strides = [1, 1]} : vector<64x256xf32> to vector<8x256xf32>
    %cst_17 = arith.constant dense<0.000000e+00> : vector<8x256xf32>
    %86 = tpu.matmul %84, %6, %cst_17 {dimension_numbers = #tpu.dot_dimension_numbers<[1], [0], [0], [1], [0, 0, 1, 1], [], []>} : vector<8x64xf32>, vector<64x256xf32>, vector<8x256xf32> -> vector<8x256xf32>
    %87 = arith.addf %85, %86 : vector<8x256xf32>
    %88 = vector.extract_strided_slice %87 {offsets = [0, 0], sizes = [8, 192], strides = [1, 1]} : vector<8x256xf32> to vector<8x192xf32>
    %89 = arith.negf %88 : vector<8x192xf32>
    %90 = math.exp %89 : vector<8x192xf32>
    %cst_18 = arith.constant 1.000000e+00 : f32
    %91 = vector.broadcast %cst_18 : f32 to vector<8x192xf32>
    %92 = arith.addf %91, %90 : vector<8x192xf32>
    %93 = arith.divf %91, %92 : vector<8x192xf32>
    %94 = vector.extract_strided_slice %87 {offsets = [0, 192], sizes = [8, 64], strides = [1, 1]} : vector<8x256xf32> to vector<8x64xf32>
    %95 = math.tanh %94 : vector<8x64xf32>
    %96 = vector.extract_strided_slice %93 {offsets = [0, 64], sizes = [8, 64], strides = [1, 1]} : vector<8x192xf32> to vector<8x64xf32>
    %97 = arith.mulf %96, %81 : vector<8x64xf32>
    %98 = vector.extract_strided_slice %93 {offsets = [0, 0], sizes = [8, 64], strides = [1, 1]} : vector<8x192xf32> to vector<8x64xf32>
    %99 = arith.mulf %98, %95 : vector<8x64xf32>
    %100 = arith.addf %97, %99 : vector<8x64xf32>
    %101 = vector.extract_strided_slice %93 {offsets = [0, 128], sizes = [8, 64], strides = [1, 1]} : vector<8x192xf32> to vector<8x64xf32>
    %102 = math.tanh %100 : vector<8x64xf32>
    %103 = arith.mulf %101, %102 : vector<8x64xf32>
    %104 = vector.extract_strided_slice %5 {offsets = [40, 0], sizes = [8, 256], strides = [1, 1]} : vector<64x256xf32> to vector<8x256xf32>
    %cst_19 = arith.constant dense<0.000000e+00> : vector<8x256xf32>
    %105 = tpu.matmul %103, %6, %cst_19 {dimension_numbers = #tpu.dot_dimension_numbers<[1], [0], [0], [1], [0, 0, 1, 1], [], []>} : vector<8x64xf32>, vector<64x256xf32>, vector<8x256xf32> -> vector<8x256xf32>
    %106 = arith.addf %104, %105 : vector<8x256xf32>
    %107 = vector.extract_strided_slice %106 {offsets = [0, 0], sizes = [8, 192], strides = [1, 1]} : vector<8x256xf32> to vector<8x192xf32>
    %108 = arith.negf %107 : vector<8x192xf32>
    %109 = math.exp %108 : vector<8x192xf32>
    %cst_20 = arith.constant 1.000000e+00 : f32
    %110 = vector.broadcast %cst_20 : f32 to vector<8x192xf32>
    %111 = arith.addf %110, %109 : vector<8x192xf32>
    %112 = arith.divf %110, %111 : vector<8x192xf32>
    %113 = vector.extract_strided_slice %106 {offsets = [0, 192], sizes = [8, 64], strides = [1, 1]} : vector<8x256xf32> to vector<8x64xf32>
    %114 = math.tanh %113 : vector<8x64xf32>
    %115 = vector.extract_strided_slice %112 {offsets = [0, 64], sizes = [8, 64], strides = [1, 1]} : vector<8x192xf32> to vector<8x64xf32>
    %116 = arith.mulf %115, %100 : vector<8x64xf32>
    %117 = vector.extract_strided_slice %112 {offsets = [0, 0], sizes = [8, 64], strides = [1, 1]} : vector<8x192xf32> to vector<8x64xf32>
    %118 = arith.mulf %117, %114 : vector<8x64xf32>
    %119 = arith.addf %116, %118 : vector<8x64xf32>
    %120 = vector.extract_strided_slice %112 {offsets = [0, 128], sizes = [8, 64], strides = [1, 1]} : vector<8x192xf32> to vector<8x64xf32>
    %121 = math.tanh %119 : vector<8x64xf32>
    %122 = arith.mulf %120, %121 : vector<8x64xf32>
    %123 = vector.extract_strided_slice %5 {offsets = [48, 0], sizes = [8, 256], strides = [1, 1]} : vector<64x256xf32> to vector<8x256xf32>
    %cst_21 = arith.constant dense<0.000000e+00> : vector<8x256xf32>
    %124 = tpu.matmul %122, %6, %cst_21 {dimension_numbers = #tpu.dot_dimension_numbers<[1], [0], [0], [1], [0, 0, 1, 1], [], []>} : vector<8x64xf32>, vector<64x256xf32>, vector<8x256xf32> -> vector<8x256xf32>
    %125 = arith.addf %123, %124 : vector<8x256xf32>
    %126 = vector.extract_strided_slice %125 {offsets = [0, 0], sizes = [8, 192], strides = [1, 1]} : vector<8x256xf32> to vector<8x192xf32>
    %127 = arith.negf %126 : vector<8x192xf32>
    %128 = math.exp %127 : vector<8x192xf32>
    %cst_22 = arith.constant 1.000000e+00 : f32
    %129 = vector.broadcast %cst_22 : f32 to vector<8x192xf32>
    %130 = arith.addf %129, %128 : vector<8x192xf32>
    %131 = arith.divf %129, %130 : vector<8x192xf32>
    %132 = vector.extract_strided_slice %125 {offsets = [0, 192], sizes = [8, 64], strides = [1, 1]} : vector<8x256xf32> to vector<8x64xf32>
    %133 = math.tanh %132 : vector<8x64xf32>
    %134 = vector.extract_strided_slice %131 {offsets = [0, 64], sizes = [8, 64], strides = [1, 1]} : vector<8x192xf32> to vector<8x64xf32>
    %135 = arith.mulf %134, %119 : vector<8x64xf32>
    %136 = vector.extract_strided_slice %131 {offsets = [0, 0], sizes = [8, 64], strides = [1, 1]} : vector<8x192xf32> to vector<8x64xf32>
    %137 = arith.mulf %136, %133 : vector<8x64xf32>
    %138 = arith.addf %135, %137 : vector<8x64xf32>
    %139 = vector.extract_strided_slice %131 {offsets = [0, 128], sizes = [8, 64], strides = [1, 1]} : vector<8x192xf32> to vector<8x64xf32>
    %140 = math.tanh %138 : vector<8x64xf32>
    %141 = arith.mulf %139, %140 : vector<8x64xf32>
    %142 = vector.extract_strided_slice %5 {offsets = [56, 0], sizes = [8, 256], strides = [1, 1]} : vector<64x256xf32> to vector<8x256xf32>
    %cst_23 = arith.constant dense<0.000000e+00> : vector<8x256xf32>
    %143 = tpu.matmul %141, %6, %cst_23 {dimension_numbers = #tpu.dot_dimension_numbers<[1], [0], [0], [1], [0, 0, 1, 1], [], []>} : vector<8x64xf32>, vector<64x256xf32>, vector<8x256xf32> -> vector<8x256xf32>
    %144 = arith.addf %142, %143 : vector<8x256xf32>
    %145 = vector.extract_strided_slice %144 {offsets = [0, 0], sizes = [8, 192], strides = [1, 1]} : vector<8x256xf32> to vector<8x192xf32>
    %146 = arith.negf %145 : vector<8x192xf32>
    %147 = math.exp %146 : vector<8x192xf32>
    %cst_24 = arith.constant 1.000000e+00 : f32
    %148 = vector.broadcast %cst_24 : f32 to vector<8x192xf32>
    %149 = arith.addf %148, %147 : vector<8x192xf32>
    %150 = arith.divf %148, %149 : vector<8x192xf32>
    %151 = vector.extract_strided_slice %144 {offsets = [0, 192], sizes = [8, 64], strides = [1, 1]} : vector<8x256xf32> to vector<8x64xf32>
    %152 = math.tanh %151 : vector<8x64xf32>
    %153 = vector.extract_strided_slice %150 {offsets = [0, 64], sizes = [8, 64], strides = [1, 1]} : vector<8x192xf32> to vector<8x64xf32>
    %154 = arith.mulf %153, %138 : vector<8x64xf32>
    %155 = vector.extract_strided_slice %150 {offsets = [0, 0], sizes = [8, 64], strides = [1, 1]} : vector<8x192xf32> to vector<8x64xf32>
    %156 = arith.mulf %155, %152 : vector<8x64xf32>
    %157 = arith.addf %154, %156 : vector<8x64xf32>
    %158 = vector.extract_strided_slice %150 {offsets = [0, 128], sizes = [8, 64], strides = [1, 1]} : vector<8x192xf32> to vector<8x64xf32>
    %159 = math.tanh %157 : vector<8x64xf32>
    %160 = arith.mulf %158, %159 : vector<8x64xf32>
    %161 = tpu.concatenate %27, %160 in 1 : vector<8x64xf32>, vector<8x64xf32> -> vector<8x128xf32>
    %162 = tpu.concatenate %46, %141 in 1 : vector<8x64xf32>, vector<8x64xf32> -> vector<8x128xf32>
    %163 = tpu.concatenate %65, %122 in 1 : vector<8x64xf32>, vector<8x64xf32> -> vector<8x128xf32>
    %164 = tpu.concatenate %84, %103 in 1 : vector<8x64xf32>, vector<8x64xf32> -> vector<8x128xf32>
    %165 = tpu.concatenate %103, %84 in 1 : vector<8x64xf32>, vector<8x64xf32> -> vector<8x128xf32>
    %166 = tpu.concatenate %122, %65 in 1 : vector<8x64xf32>, vector<8x64xf32> -> vector<8x128xf32>
    %167 = tpu.concatenate %141, %46 in 1 : vector<8x64xf32>, vector<8x64xf32> -> vector<8x128xf32>
    %168 = tpu.concatenate %160, %27 in 1 : vector<8x64xf32>, vector<8x64xf32> -> vector<8x128xf32>
    %169 = tpu.concatenate %161, %162, %163, %164, %165, %166, %167, %168 in 0 : vector<8x128xf32>, vector<8x128xf32>, vector<8x128xf32>, vector<8x128xf32>, vector<8x128xf32>, vector<8x128xf32>, vector<8x128xf32>, vector<8x128xf32> -> vector<64x128xf32>
    %c0_25 = arith.constant 0 : index
    %c0_26 = arith.constant 0 : index
    %170 = vector.load %arg4[%c0_25, %c0_26] : memref<128x256xf32, #tpu.memory_space<vmem>>, vector<128x256xf32>
    %cst_27 = arith.constant dense<0.000000e+00> : vector<64x256xf32>
    %171 = tpu.matmul %169, %170, %cst_27 {dimension_numbers = #tpu.dot_dimension_numbers<[1], [0], [0], [1], [0, 0, 1, 1], [], []>} : vector<64x128xf32>, vector<128x256xf32>, vector<64x256xf32> -> vector<64x256xf32>
    %c0_28 = arith.constant 0 : index
    %c0_29 = arith.constant 0 : index
    %172 = vector.load %arg5[%c0_28, %c0_29] : memref<1x256xf32, #tpu.memory_space<vmem>>, vector<1x256xf32>
    %173 = vector.broadcast %172 : vector<1x256xf32> to vector<64x256xf32>
    %174 = arith.addf %171, %173 : vector<64x256xf32>
    %c0_30 = arith.constant 0 : index
    %c0_31 = arith.constant 0 : index
    %175 = vector.load %arg6[%c0_30, %c0_31] : memref<64x256xf32, #tpu.memory_space<vmem>>, vector<64x256xf32>
    %cst_32 = arith.constant 0.000000e+00 : f32
    %176 = vector.broadcast %cst_32 : f32 to vector<8x64xf32>
    %cst_33 = arith.constant 0.000000e+00 : f32
    %177 = vector.broadcast %cst_33 : f32 to vector<8x64xf32>
    %178 = vector.extract_strided_slice %174 {offsets = [0, 0], sizes = [8, 256], strides = [1, 1]} : vector<64x256xf32> to vector<8x256xf32>
    %cst_34 = arith.constant dense<0.000000e+00> : vector<8x256xf32>
    %179 = tpu.matmul %176, %175, %cst_34 {dimension_numbers = #tpu.dot_dimension_numbers<[1], [0], [0], [1], [0, 0, 1, 1], [], []>} : vector<8x64xf32>, vector<64x256xf32>, vector<8x256xf32> -> vector<8x256xf32>
    %180 = arith.addf %178, %179 : vector<8x256xf32>
    %181 = vector.extract_strided_slice %180 {offsets = [0, 0], sizes = [8, 192], strides = [1, 1]} : vector<8x256xf32> to vector<8x192xf32>
    %182 = arith.negf %181 : vector<8x192xf32>
    %183 = math.exp %182 : vector<8x192xf32>
    %cst_35 = arith.constant 1.000000e+00 : f32
    %184 = vector.broadcast %cst_35 : f32 to vector<8x192xf32>
    %185 = arith.addf %184, %183 : vector<8x192xf32>
    %186 = arith.divf %184, %185 : vector<8x192xf32>
    %187 = vector.extract_strided_slice %180 {offsets = [0, 192], sizes = [8, 64], strides = [1, 1]} : vector<8x256xf32> to vector<8x64xf32>
    %188 = math.tanh %187 : vector<8x64xf32>
    %189 = vector.extract_strided_slice %186 {offsets = [0, 64], sizes = [8, 64], strides = [1, 1]} : vector<8x192xf32> to vector<8x64xf32>
    %190 = arith.mulf %189, %177 : vector<8x64xf32>
    %191 = vector.extract_strided_slice %186 {offsets = [0, 0], sizes = [8, 64], strides = [1, 1]} : vector<8x192xf32> to vector<8x64xf32>
    %192 = arith.mulf %191, %188 : vector<8x64xf32>
    %193 = arith.addf %190, %192 : vector<8x64xf32>
    %194 = vector.extract_strided_slice %186 {offsets = [0, 128], sizes = [8, 64], strides = [1, 1]} : vector<8x192xf32> to vector<8x64xf32>
    %195 = math.tanh %193 : vector<8x64xf32>
    %196 = arith.mulf %194, %195 : vector<8x64xf32>
    %197 = vector.extract_strided_slice %174 {offsets = [8, 0], sizes = [8, 256], strides = [1, 1]} : vector<64x256xf32> to vector<8x256xf32>
    %cst_36 = arith.constant dense<0.000000e+00> : vector<8x256xf32>
    %198 = tpu.matmul %196, %175, %cst_36 {dimension_numbers = #tpu.dot_dimension_numbers<[1], [0], [0], [1], [0, 0, 1, 1], [], []>} : vector<8x64xf32>, vector<64x256xf32>, vector<8x256xf32> -> vector<8x256xf32>
    %199 = arith.addf %197, %198 : vector<8x256xf32>
    %200 = vector.extract_strided_slice %199 {offsets = [0, 0], sizes = [8, 192], strides = [1, 1]} : vector<8x256xf32> to vector<8x192xf32>
    %201 = arith.negf %200 : vector<8x192xf32>
    %202 = math.exp %201 : vector<8x192xf32>
    %cst_37 = arith.constant 1.000000e+00 : f32
    %203 = vector.broadcast %cst_37 : f32 to vector<8x192xf32>
    %204 = arith.addf %203, %202 : vector<8x192xf32>
    %205 = arith.divf %203, %204 : vector<8x192xf32>
    %206 = vector.extract_strided_slice %199 {offsets = [0, 192], sizes = [8, 64], strides = [1, 1]} : vector<8x256xf32> to vector<8x64xf32>
    %207 = math.tanh %206 : vector<8x64xf32>
    %208 = vector.extract_strided_slice %205 {offsets = [0, 64], sizes = [8, 64], strides = [1, 1]} : vector<8x192xf32> to vector<8x64xf32>
    %209 = arith.mulf %208, %193 : vector<8x64xf32>
    %210 = vector.extract_strided_slice %205 {offsets = [0, 0], sizes = [8, 64], strides = [1, 1]} : vector<8x192xf32> to vector<8x64xf32>
    %211 = arith.mulf %210, %207 : vector<8x64xf32>
    %212 = arith.addf %209, %211 : vector<8x64xf32>
    %213 = vector.extract_strided_slice %205 {offsets = [0, 128], sizes = [8, 64], strides = [1, 1]} : vector<8x192xf32> to vector<8x64xf32>
    %214 = math.tanh %212 : vector<8x64xf32>
    %215 = arith.mulf %213, %214 : vector<8x64xf32>
    %216 = vector.extract_strided_slice %174 {offsets = [16, 0], sizes = [8, 256], strides = [1, 1]} : vector<64x256xf32> to vector<8x256xf32>
    %cst_38 = arith.constant dense<0.000000e+00> : vector<8x256xf32>
    %217 = tpu.matmul %215, %175, %cst_38 {dimension_numbers = #tpu.dot_dimension_numbers<[1], [0], [0], [1], [0, 0, 1, 1], [], []>} : vector<8x64xf32>, vector<64x256xf32>, vector<8x256xf32> -> vector<8x256xf32>
    %218 = arith.addf %216, %217 : vector<8x256xf32>
    %219 = vector.extract_strided_slice %218 {offsets = [0, 0], sizes = [8, 192], strides = [1, 1]} : vector<8x256xf32> to vector<8x192xf32>
    %220 = arith.negf %219 : vector<8x192xf32>
    %221 = math.exp %220 : vector<8x192xf32>
    %cst_39 = arith.constant 1.000000e+00 : f32
    %222 = vector.broadcast %cst_39 : f32 to vector<8x192xf32>
    %223 = arith.addf %222, %221 : vector<8x192xf32>
    %224 = arith.divf %222, %223 : vector<8x192xf32>
    %225 = vector.extract_strided_slice %218 {offsets = [0, 192], sizes = [8, 64], strides = [1, 1]} : vector<8x256xf32> to vector<8x64xf32>
    %226 = math.tanh %225 : vector<8x64xf32>
    %227 = vector.extract_strided_slice %224 {offsets = [0, 64], sizes = [8, 64], strides = [1, 1]} : vector<8x192xf32> to vector<8x64xf32>
    %228 = arith.mulf %227, %212 : vector<8x64xf32>
    %229 = vector.extract_strided_slice %224 {offsets = [0, 0], sizes = [8, 64], strides = [1, 1]} : vector<8x192xf32> to vector<8x64xf32>
    %230 = arith.mulf %229, %226 : vector<8x64xf32>
    %231 = arith.addf %228, %230 : vector<8x64xf32>
    %232 = vector.extract_strided_slice %224 {offsets = [0, 128], sizes = [8, 64], strides = [1, 1]} : vector<8x192xf32> to vector<8x64xf32>
    %233 = math.tanh %231 : vector<8x64xf32>
    %234 = arith.mulf %232, %233 : vector<8x64xf32>
    %235 = vector.extract_strided_slice %174 {offsets = [24, 0], sizes = [8, 256], strides = [1, 1]} : vector<64x256xf32> to vector<8x256xf32>
    %cst_40 = arith.constant dense<0.000000e+00> : vector<8x256xf32>
    %236 = tpu.matmul %234, %175, %cst_40 {dimension_numbers = #tpu.dot_dimension_numbers<[1], [0], [0], [1], [0, 0, 1, 1], [], []>} : vector<8x64xf32>, vector<64x256xf32>, vector<8x256xf32> -> vector<8x256xf32>
    %237 = arith.addf %235, %236 : vector<8x256xf32>
    %238 = vector.extract_strided_slice %237 {offsets = [0, 0], sizes = [8, 192], strides = [1, 1]} : vector<8x256xf32> to vector<8x192xf32>
    %239 = arith.negf %238 : vector<8x192xf32>
    %240 = math.exp %239 : vector<8x192xf32>
    %cst_41 = arith.constant 1.000000e+00 : f32
    %241 = vector.broadcast %cst_41 : f32 to vector<8x192xf32>
    %242 = arith.addf %241, %240 : vector<8x192xf32>
    %243 = arith.divf %241, %242 : vector<8x192xf32>
    %244 = vector.extract_strided_slice %237 {offsets = [0, 192], sizes = [8, 64], strides = [1, 1]} : vector<8x256xf32> to vector<8x64xf32>
    %245 = math.tanh %244 : vector<8x64xf32>
    %246 = vector.extract_strided_slice %243 {offsets = [0, 64], sizes = [8, 64], strides = [1, 1]} : vector<8x192xf32> to vector<8x64xf32>
    %247 = arith.mulf %246, %231 : vector<8x64xf32>
    %248 = vector.extract_strided_slice %243 {offsets = [0, 0], sizes = [8, 64], strides = [1, 1]} : vector<8x192xf32> to vector<8x64xf32>
    %249 = arith.mulf %248, %245 : vector<8x64xf32>
    %250 = arith.addf %247, %249 : vector<8x64xf32>
    %251 = vector.extract_strided_slice %243 {offsets = [0, 128], sizes = [8, 64], strides = [1, 1]} : vector<8x192xf32> to vector<8x64xf32>
    %252 = math.tanh %250 : vector<8x64xf32>
    %253 = arith.mulf %251, %252 : vector<8x64xf32>
    %254 = vector.extract_strided_slice %174 {offsets = [32, 0], sizes = [8, 256], strides = [1, 1]} : vector<64x256xf32> to vector<8x256xf32>
    %cst_42 = arith.constant dense<0.000000e+00> : vector<8x256xf32>
    %255 = tpu.matmul %253, %175, %cst_42 {dimension_numbers = #tpu.dot_dimension_numbers<[1], [0], [0], [1], [0, 0, 1, 1], [], []>} : vector<8x64xf32>, vector<64x256xf32>, vector<8x256xf32> -> vector<8x256xf32>
    %256 = arith.addf %254, %255 : vector<8x256xf32>
    %257 = vector.extract_strided_slice %256 {offsets = [0, 0], sizes = [8, 192], strides = [1, 1]} : vector<8x256xf32> to vector<8x192xf32>
    %258 = arith.negf %257 : vector<8x192xf32>
    %259 = math.exp %258 : vector<8x192xf32>
    %cst_43 = arith.constant 1.000000e+00 : f32
    %260 = vector.broadcast %cst_43 : f32 to vector<8x192xf32>
    %261 = arith.addf %260, %259 : vector<8x192xf32>
    %262 = arith.divf %260, %261 : vector<8x192xf32>
    %263 = vector.extract_strided_slice %256 {offsets = [0, 192], sizes = [8, 64], strides = [1, 1]} : vector<8x256xf32> to vector<8x64xf32>
    %264 = math.tanh %263 : vector<8x64xf32>
    %265 = vector.extract_strided_slice %262 {offsets = [0, 64], sizes = [8, 64], strides = [1, 1]} : vector<8x192xf32> to vector<8x64xf32>
    %266 = arith.mulf %265, %250 : vector<8x64xf32>
    %267 = vector.extract_strided_slice %262 {offsets = [0, 0], sizes = [8, 64], strides = [1, 1]} : vector<8x192xf32> to vector<8x64xf32>
    %268 = arith.mulf %267, %264 : vector<8x64xf32>
    %269 = arith.addf %266, %268 : vector<8x64xf32>
    %270 = vector.extract_strided_slice %262 {offsets = [0, 128], sizes = [8, 64], strides = [1, 1]} : vector<8x192xf32> to vector<8x64xf32>
    %271 = math.tanh %269 : vector<8x64xf32>
    %272 = arith.mulf %270, %271 : vector<8x64xf32>
    %273 = vector.extract_strided_slice %174 {offsets = [40, 0], sizes = [8, 256], strides = [1, 1]} : vector<64x256xf32> to vector<8x256xf32>
    %cst_44 = arith.constant dense<0.000000e+00> : vector<8x256xf32>
    %274 = tpu.matmul %272, %175, %cst_44 {dimension_numbers = #tpu.dot_dimension_numbers<[1], [0], [0], [1], [0, 0, 1, 1], [], []>} : vector<8x64xf32>, vector<64x256xf32>, vector<8x256xf32> -> vector<8x256xf32>
    %275 = arith.addf %273, %274 : vector<8x256xf32>
    %276 = vector.extract_strided_slice %275 {offsets = [0, 0], sizes = [8, 192], strides = [1, 1]} : vector<8x256xf32> to vector<8x192xf32>
    %277 = arith.negf %276 : vector<8x192xf32>
    %278 = math.exp %277 : vector<8x192xf32>
    %cst_45 = arith.constant 1.000000e+00 : f32
    %279 = vector.broadcast %cst_45 : f32 to vector<8x192xf32>
    %280 = arith.addf %279, %278 : vector<8x192xf32>
    %281 = arith.divf %279, %280 : vector<8x192xf32>
    %282 = vector.extract_strided_slice %275 {offsets = [0, 192], sizes = [8, 64], strides = [1, 1]} : vector<8x256xf32> to vector<8x64xf32>
    %283 = math.tanh %282 : vector<8x64xf32>
    %284 = vector.extract_strided_slice %281 {offsets = [0, 64], sizes = [8, 64], strides = [1, 1]} : vector<8x192xf32> to vector<8x64xf32>
    %285 = arith.mulf %284, %269 : vector<8x64xf32>
    %286 = vector.extract_strided_slice %281 {offsets = [0, 0], sizes = [8, 64], strides = [1, 1]} : vector<8x192xf32> to vector<8x64xf32>
    %287 = arith.mulf %286, %283 : vector<8x64xf32>
    %288 = arith.addf %285, %287 : vector<8x64xf32>
    %289 = vector.extract_strided_slice %281 {offsets = [0, 128], sizes = [8, 64], strides = [1, 1]} : vector<8x192xf32> to vector<8x64xf32>
    %290 = math.tanh %288 : vector<8x64xf32>
    %291 = arith.mulf %289, %290 : vector<8x64xf32>
    %292 = vector.extract_strided_slice %174 {offsets = [48, 0], sizes = [8, 256], strides = [1, 1]} : vector<64x256xf32> to vector<8x256xf32>
    %cst_46 = arith.constant dense<0.000000e+00> : vector<8x256xf32>
    %293 = tpu.matmul %291, %175, %cst_46 {dimension_numbers = #tpu.dot_dimension_numbers<[1], [0], [0], [1], [0, 0, 1, 1], [], []>} : vector<8x64xf32>, vector<64x256xf32>, vector<8x256xf32> -> vector<8x256xf32>
    %294 = arith.addf %292, %293 : vector<8x256xf32>
    %295 = vector.extract_strided_slice %294 {offsets = [0, 0], sizes = [8, 192], strides = [1, 1]} : vector<8x256xf32> to vector<8x192xf32>
    %296 = arith.negf %295 : vector<8x192xf32>
    %297 = math.exp %296 : vector<8x192xf32>
    %cst_47 = arith.constant 1.000000e+00 : f32
    %298 = vector.broadcast %cst_47 : f32 to vector<8x192xf32>
    %299 = arith.addf %298, %297 : vector<8x192xf32>
    %300 = arith.divf %298, %299 : vector<8x192xf32>
    %301 = vector.extract_strided_slice %294 {offsets = [0, 192], sizes = [8, 64], strides = [1, 1]} : vector<8x256xf32> to vector<8x64xf32>
    %302 = math.tanh %301 : vector<8x64xf32>
    %303 = vector.extract_strided_slice %300 {offsets = [0, 64], sizes = [8, 64], strides = [1, 1]} : vector<8x192xf32> to vector<8x64xf32>
    %304 = arith.mulf %303, %288 : vector<8x64xf32>
    %305 = vector.extract_strided_slice %300 {offsets = [0, 0], sizes = [8, 64], strides = [1, 1]} : vector<8x192xf32> to vector<8x64xf32>
    %306 = arith.mulf %305, %302 : vector<8x64xf32>
    %307 = arith.addf %304, %306 : vector<8x64xf32>
    %308 = vector.extract_strided_slice %300 {offsets = [0, 128], sizes = [8, 64], strides = [1, 1]} : vector<8x192xf32> to vector<8x64xf32>
    %309 = math.tanh %307 : vector<8x64xf32>
    %310 = arith.mulf %308, %309 : vector<8x64xf32>
    %311 = vector.extract_strided_slice %174 {offsets = [56, 0], sizes = [8, 256], strides = [1, 1]} : vector<64x256xf32> to vector<8x256xf32>
    %cst_48 = arith.constant dense<0.000000e+00> : vector<8x256xf32>
    %312 = tpu.matmul %310, %175, %cst_48 {dimension_numbers = #tpu.dot_dimension_numbers<[1], [0], [0], [1], [0, 0, 1, 1], [], []>} : vector<8x64xf32>, vector<64x256xf32>, vector<8x256xf32> -> vector<8x256xf32>
    %313 = arith.addf %311, %312 : vector<8x256xf32>
    %314 = vector.extract_strided_slice %313 {offsets = [0, 0], sizes = [8, 192], strides = [1, 1]} : vector<8x256xf32> to vector<8x192xf32>
    %315 = arith.negf %314 : vector<8x192xf32>
    %316 = math.exp %315 : vector<8x192xf32>
    %cst_49 = arith.constant 1.000000e+00 : f32
    %317 = vector.broadcast %cst_49 : f32 to vector<8x192xf32>
    %318 = arith.addf %317, %316 : vector<8x192xf32>
    %319 = arith.divf %317, %318 : vector<8x192xf32>
    %320 = vector.extract_strided_slice %313 {offsets = [0, 192], sizes = [8, 64], strides = [1, 1]} : vector<8x256xf32> to vector<8x64xf32>
    %321 = math.tanh %320 : vector<8x64xf32>
    %322 = vector.extract_strided_slice %319 {offsets = [0, 64], sizes = [8, 64], strides = [1, 1]} : vector<8x192xf32> to vector<8x64xf32>
    %323 = arith.mulf %322, %307 : vector<8x64xf32>
    %324 = vector.extract_strided_slice %319 {offsets = [0, 0], sizes = [8, 64], strides = [1, 1]} : vector<8x192xf32> to vector<8x64xf32>
    %325 = arith.mulf %324, %321 : vector<8x64xf32>
    %326 = arith.addf %323, %325 : vector<8x64xf32>
    %327 = vector.extract_strided_slice %319 {offsets = [0, 128], sizes = [8, 64], strides = [1, 1]} : vector<8x192xf32> to vector<8x64xf32>
    %328 = math.tanh %326 : vector<8x64xf32>
    %329 = arith.mulf %327, %328 : vector<8x64xf32>
    %c0_50 = arith.constant 0 : index
    %c0_51 = arith.constant 0 : index
    %330 = vector.load %arg7[%c0_50, %c0_51] : memref<64x16xf32, #tpu.memory_space<vmem>>, vector<64x16xf32>
    %cst_52 = arith.constant dense<0.000000e+00> : vector<8x16xf32>
    %331 = tpu.matmul %329, %330, %cst_52 {dimension_numbers = #tpu.dot_dimension_numbers<[1], [0], [0], [1], [0, 0, 1, 1], [], []>} : vector<8x64xf32>, vector<64x16xf32>, vector<8x16xf32> -> vector<8x16xf32>
    %c0_53 = arith.constant 0 : index
    %c0_54 = arith.constant 0 : index
    %332 = vector.load %arg8[%c0_53, %c0_54] : memref<1x16xf32, #tpu.memory_space<vmem>>, vector<1x16xf32>
    %333 = vector.broadcast %332 : vector<1x16xf32> to vector<8x16xf32>
    %334 = arith.addf %331, %333 : vector<8x16xf32>
    %cst_55 = arith.constant 0.000000e+00 : f32
    %335 = vector.broadcast %cst_55 : f32 to vector<8x16xf32>
    %336 = arith.cmpf oge, %334, %335 : vector<8x16xf32>
    %cst_56 = arith.constant 2.000000e-01 : f32
    %337 = vector.broadcast %cst_56 : f32 to vector<8x16xf32>
    %338 = arith.mulf %337, %334 : vector<8x16xf32>
    %339 = arith.select %336, %334, %338 : vector<8x16xi1>, vector<8x16xf32>
    %c0_57 = arith.constant 0 : index
    %c0_58 = arith.constant 0 : index
    %340 = vector.load %arg9[%c0_57, %c0_58] : memref<16x1xf32, #tpu.memory_space<vmem>>, vector<16x1xf32>
    %cst_59 = arith.constant dense<0.000000e+00> : vector<8x1xf32>
    %341 = tpu.matmul %339, %340, %cst_59 {dimension_numbers = #tpu.dot_dimension_numbers<[1], [0], [0], [1], [0, 0, 1, 1], [], []>} : vector<8x16xf32>, vector<16x1xf32>, vector<8x1xf32> -> vector<8x1xf32>
    %c0_60 = arith.constant 0 : index
    %c0_61 = arith.constant 0 : index
    %342 = vector.load %arg10[%c0_60, %c0_61] : memref<1x1xf32, #tpu.memory_space<vmem>>, vector<1x1xf32>
    %343 = vector.broadcast %342 : vector<1x1xf32> to vector<8x1xf32>
    %344 = arith.addf %341, %343 : vector<8x1xf32>
    %c0_62 = arith.constant 0 : index
    %c0_63 = arith.constant 0 : index
    %345 = vector.load %arg11[%c0_62, %c0_63] : memref<8x1xf32, #tpu.memory_space<vmem>>, vector<8x1xf32>
    tpu.vector_store %arg11[%c0_62, %c0_63], %344 {strides = array<i32>} : memref<8x1xf32, #tpu.memory_space<vmem>>, vector<8x1xf32>,
    return
  }
}

</mosaic_0001>

<bundles_post_ra>
// kernel: tpu_custom_call.1
= control target key start
LH: loop header
LB: loop body
LE: loop exit
PB: predicated region body
PF: predicated region fallthrough
CT: control target
= control target key end

     0   :  { %s3630_s0 = inlined_call_operand.vmem [shape: f32[64,8], index: 0, kind: input, shape index: {}]   ;;  %s3631_s1 = inlined_call_operand.vmem [shape: f32[8,256], index: 1, kind: input, shape index: {}]   ;;  %s3632_s2 = inlined_call_operand.vmem [shape: f32[1,256], index: 2, kind: input, shape index: {}]   ;;  %s3633_s3 = inlined_call_operand.vmem [shape: f32[64,256], index: 3, kind: input, shape index: {}]   ;;  %s3634_s4 = inlined_call_operand.hbm [shape: f32[128,256], index: 4, kind: input, shape index: {}]   ;;  %s3635_s5 = inlined_call_operand.vmem [shape: f32[1,256], index: 5, kind: input, shape index: {}]   ;;  %s3636_s6 = inlined_call_operand.hbm [shape: f32[64,256], index: 6, kind: input, shape index: {}]   ;;  %s3637_s7 = inlined_call_operand.vmem [shape: f32[64,16], index: 7, kind: input, shape index: {}]   ;;  %s3638_s8 = inlined_call_operand.vmem [shape: f32[1,16], index: 8, kind: input, shape index: {}]   ;;  %s3639_s9 = inlined_call_operand.vmem [shape: f32[16,1], index: 9, kind: input, shape index: {}]   ;;  %s3640_s10 = inlined_call_operand.<no memory space> [shape: f32[1,1], index: 10, kind: input, shape index: {}]   ;;  %s3641_s11 = inlined_call_operand.vmem [shape: f32[8,1], index: 11, kind: output, shape index: {}]  }
   0x1   :  { %v16_v0 = vstv %s3640_s10 }
   0x2   :  { %17 = vst [vmem:[#allocation2] sm:$0x1] %v16_v0 }
   0x3   :  { %18 = vsyncpa [#allocation4], 0 }
   0x4   :  { %19 = vsyncpa [#allocation6], 0  ;;  %s3037_s19 = smov [#allocation3]   ;;  %s2989_s23 = scalar_lea.hbm %s3634_s4, 4096 }
   0x5   :  { %s33_s20 = sshll.u32 %s3037_s19, 4  ;;  %p2990_p0 = scmp.ne.s32.totalorder %s3634_s4, %s2989_s23  ;;  %s34_s20 = int_to_ptr.vmem [resolvable:$true] %s33_s20 }
   0x6   :  { %p2993_p1 = scmp.lt.u32.totalorder %s2989_s23, %s3634_s4 }
   0x8   :  { %p2995_p2 = pnand %p2993_p1, %p2990_p0 }
   0xa   :  { %2998 = shalt.err (!%p2995_p2)
}
   0xb   :  { %s2999_s10 = scalar_lea.vmem %s34_s20, 4096  ;;  %p3004_p4 = scmp.lt.s32.totalorder %s34_s20, %s34_s20 }
   0xc   :  { %p3000_p3 = scmp.ne.s32.totalorder %s34_s20, %s2999_s10  ;;  %p3005_p5 = scmp.lt.s32.totalorder %s2999_s10, %s2999_s10 }
   0xe   :  { %p3006_p6 = por %p3005_p5, %p3004_p4 }
  0x10   :  { %p3007_p7 = pnand %p3006_p6, %p3000_p3 }
  0x12   :  { %3010 = shalt.err (!%p3007_p7)
}
  0x13   :  { %s3038_s28 = smov 256   ;;  %s3039_s29 = smov 16  }
  0x14   :  { %39 = dma.hbm_to_vmem [thread:$0]  %s3634_s4, 4096, %s34_s20, [#allocation4], %s3038_s28, %s3038_s28, %s3039_s29  }
  0x15   :  { %s3040_s13 = smov [#allocation5]   ;;  %s3011_s17 = scalar_lea.hbm %s3636_s6, 2048 }
  0x16   :  { %s47_s14 = sshll.u32 %s3040_s13, 4  ;;  %p3012_p8 = scmp.ne.s32.totalorder %s3636_s6, %s3011_s17  ;;  %s48_s14 = int_to_ptr.vmem [resolvable:$true] %s47_s14 }
  0x17   :  { %p3015_p9 = scmp.lt.u32.totalorder %s3011_s17, %s3636_s6 }
  0x19   :  { %p3017_p10 = pnand %p3015_p9, %p3012_p8 }
  0x1b   :  { %3020 = shalt.err (!%p3017_p10)
}
  0x1c   :  { %s3021_s23 = scalar_lea.vmem %s48_s14, 2048  ;;  %p3026_p12 = scmp.lt.s32.totalorder %s48_s14, %s48_s14 }
  0x1d   :  { %p3022_p11 = scmp.ne.s32.totalorder %s48_s14, %s3021_s23  ;;  %p3027_p13 = scmp.lt.s32.totalorder %s3021_s23, %s3021_s23 }
  0x1f   :  { %p3028_p0 = por %p3027_p13, %p3026_p12 }
  0x21   :  { %p3029_p1 = pnand %p3028_p0, %p3022_p11 }
  0x23   :  { %3032 = shalt.err (!%p3029_p1)
}
  0x24   :  { %53 = dma.hbm_to_vmem [thread:$0]  %s3636_s6, 2048, %s48_s14, [#allocation6], %s3038_s28, %s3038_s28, %s3039_s29  }
  0x25   :  { %3033 = dma.done.wait [#allocation4], 4096  }
  0x26   :  { %3034 = vsyncadd [#allocation4], 4294963200 }
  0x27   :  { %3035 = dma.done.wait [#allocation6], 2048  }
  0x28   :  { %3036 = vsyncadd [#allocation6], 4294965248  ;;  %v3041_v1 = vmov 0.0   ;;  %v77_v2 = vld [vmem:[%s3631_s1 + $0x8] sm:$0xff]  ;;  %v76_v3 = vld [vmem:[%s3631_s1] sm:$0xff]  ;;  %vm90_vm0 = vcmask 64512   ;;  %v80_v36 = vlaneseq }
  0x29   :  { %179 = vmatprep.mubr.f32.mxu0 %v3041_v1  ;;  %1234 = vmatprep.mubr.f32.mxu1 %v3041_v1  ;;  %v68_v4 = vld [vmem:[%s3630_s0] sm:$0xff]  ;;  %v229_v5 = vld [vmem:[%s3633_s3 + $0x8] sm:$0xff]  ;;  %v231_v6 = vld [vmem:[%s3633_s3 + $0x18] sm:$0xff]  ;;  %s3042_s6 = smov 64   ;;  %vm244_vm1 = vcmask 523264   ;;  %vm3044_vm2 = vmmov 0  }
  0x2a   :  { %115 = vmatprep.subr.mxu0 %v77_v2  ;;  %v228_v7 = vld [vmem:[%s3633_s3] sm:$0xff]  ;;  %v3152_v8 = vpack.c.bf16 %v231_v6, %v229_v5  ;;  %v230_v9 = vld [vmem:[%s3633_s3 + $0x10] sm:$0xff]  ;;  %v233_v11 = vld [vmem:[%s3633_s3 + $0x28] sm:$0xff]  ;;  %v3263_v37 = vshrl.u32 %v80_v36, 7  ;;  %vm2244_vm4 = vcmask 130048   ;;  %vm2318_vm5 = vcmask 7168  }
  0x2b   :  { %116 = vmatpush1.msra.mxu0 %v76_v3  ;;  %v3158_v10 = vpack.c.bf16 %v230_v9, %v228_v7  ;;  %v235_v12 = vld [vmem:[%s3633_s3 + $0x38] sm:$0xff]  ;;  %v232_v13 = vld [vmem:[%s3633_s3 + $0x20] sm:$0xff]  ;;  %v69_v14 = vld [vmem:[%s3630_s0 + $0x8] sm:$0xff] }
  0x2c   :  { %2326 = vmatmul.mubr.msk.f32.vlgmr.msra.gmra.mrb[0].mxu0 %vm90_vm0, %v68_v4  ;;  %2423 = vmatprep.subr.bf16.mxu0 %v3152_v8  ;;  %v3174_v15 = vpack.c.bf16 %v235_v12, %v233_v11  ;;  %v234_v16 = vld [vmem:[%s3633_s3 + $0x30] sm:$0xff]  ;;  %v237_v18 = vld [vmem:[%s3633_s3 + $0x48] sm:$0xff]  ;;  %v239_v19 = vld [vmem:[%s3633_s3 + $0x58] sm:$0xff]  ;;  %v86_v38 = vsub.s32 1, %v3263_v37  ;;  %v82_v45 = vsub.s32 0, %v3263_v37 }
  0x2d   :  { %185 = vmatprep.mubr.f32.mxu0 %v3041_v1  ;;  %2425 = vmatpush1.bf16.msra.mxu0 %v3158_v10  ;;  %v3180_v17 = vpack.c.bf16 %v234_v16, %v232_v13  ;;  %v3189_v20 = vpack.c.bf16 %v239_v19, %v237_v18  ;;  %v236_v21 = vld [vmem:[%s3633_s3 + $0x40] sm:$0xff]  ;;  %v238_v22 = vld [vmem:[%s3633_s3 + $0x50] sm:$0xff]  ;;  %v241_v23 = vld [vmem:[%s3633_s3 + $0x68] sm:$0xff] }
  0x2e   :  { %2427 = vmatprep.subr.bf16.mxu0 %v3174_v15  ;;  %v243_v24 = vld [vmem:[%s3633_s3 + $0x78] sm:$0xff]  ;;  %v70_v25 = vld [vmem:[%s3630_s0 + $0x10] sm:$0xff]  ;;  %v3209_v26 = vpack.c.bf16 %v238_v22, %v236_v21  ;;  %v240_v28 = vld [vmem:[%s3633_s3 + $0x60] sm:$0xff] }
  0x2f   :  { %v3212_v27 = vpack.c.bf16 %v243_v24, %v241_v23  ;;  %v242_v29 = vld [vmem:[%s3633_s3 + $0x70] sm:$0xff]  ;;  %v71_v30 = vld [vmem:[%s3630_s0 + $0x18] sm:$0xff]  ;;  %v72_v32 = vld [vmem:[%s3630_s0 + $0x20] sm:$0xff] }
  0x30   :  { %2327 = vmatmul.mubr.msk.f32.gmra.mrb[2].mxu0 %vm90_vm0, %v69_v14  ;;  %v3226_v31 = vpack.c.bf16 %v242_v29, %v240_v28  ;;  %v73_v33 = vld [vmem:[%s3630_s0 + $0x28] sm:$0xff]  ;;  %v74_v34 = vld [vmem:[%s3630_s0 + $0x30] sm:$0xff]  ;;  %v75_v35 = vld [vmem:[%s3630_s0 + $0x38] sm:$0xff] }
  0x31   :  { %191 = vmatprep.mubr.f32.mxu0 %v3041_v1  ;;  %2429 = vmatpush1.bf16.msra.mxu0 %v3180_v17  ;;  %v78_v39 = vld [vmem:[%s3632_s2] sm:$0x3] }
  0x32   :  { %2431 = vmatprep.subr.bf16.mxu0 %v3189_v20  ;;  %v3271_v40 = vrot.slane %v78_v39, %v86_v38  ;;  %v3278_v46 = vrot.slane %v78_v39, %v82_v45 }
  0x34   :  { %2328 = vmatmul.mubr.msk.f32.gmra.mrb[4].mxu0 %vm90_vm0, %v70_v25 }
  0x35   :  { %197 = vmatprep.mubr.f32.mxu0 %v3041_v1  ;;  %2433 = vmatpush1.bf16.msra.mxu0 %v3209_v26 }
  0x36   :  { %2435 = vmatprep.subr.bf16.mxu0 %v3212_v27 }
  0x38   :  { %2329 = vmatmul.mubr.msk.f32.gmra.mrb[6].mxu0 %vm90_vm0, %v71_v30 }
  0x39   :  { %203 = vmatprep.mubr.f32.mxu0 %v3041_v1  ;;  %2437 = vmatpush1.bf16.msra.mxu0 %v3226_v31 }
  0x3a   :  { %2439 = vmatprep.subr.bf16.mxu0 %v3152_v8 }
  0x3c   :  { %2330 = vmatmul.mubr.msk.f32.gmra.mrb[8].mxu0 %vm90_vm0, %v72_v32 }
  0x3d   :  { %209 = vmatprep.mubr.f32.mxu0 %v3041_v1 }
  0x40   :  { %2331 = vmatmul.mubr.msk.f32.gmra.mrb[10].mxu0 %vm90_vm0, %v73_v33 }
  0x41   :  { %215 = vmatprep.mubr.f32.mxu0 %v3041_v1 }
  0x44   :  { %2332 = vmatmul.mubr.msk.f32.gmra.mrb[12].mxu0 %vm90_vm0, %v74_v34 }
  0x45   :  { %221 = vmatprep.mubr.f32.mxu0 %v3041_v1 }
  0x48   :  { %2333 = vmatmul.mubr.msk.f32.gmra.mrb[14].mxu0 %vm90_vm0, %v75_v35 }
  0x49   :  { %312 = vmatprep.mubr.f32.mxu0 %v3041_v1 }
  0x4c   :  { %313 = vmatmul.mubr.f32.vlgmr.msra.gmra.mrb[0].mxu0 %v3041_v1 }
  0x4d   :  { %2441 = vmatpush1.bf16.msra.mxu0 %v3158_v10  ;;  %418 = vmatprep.mubr.f32.mxu0 %v3041_v1 }
  0x4e   :  { %2443 = vmatprep.subr.bf16.mxu0 %v3174_v15 }
  0x51   :  { %2445 = vmatpush1.bf16.msra.mxu0 %v3180_v17 }
  0x52   :  { %2447 = vmatprep.subr.bf16.mxu0 %v3189_v20 }
  0x55   :  { %2449 = vmatpush1.bf16.msra.mxu0 %v3209_v26 }
  0x56   :  { %2451 = vmatprep.subr.bf16.mxu0 %v3212_v27 }
  0x59   :  { %2453 = vmatpush1.bf16.msra.mxu0 %v3226_v31 }
  0x5a   :  { %2455 = vmatprep.subr.bf16.mxu0 %v3152_v8 }
 0x11f   :  { %v314_v41 = vpop.f32.mrb[0].mxu0 }
 0x120   :  { %v316_v42 = vpop.f32.mrb[1].mxu0  ;;  %v2725_v47 = vadd.f32 %v314_v41, %v3278_v46 }
 0x121   :  { %v2726_v43 = vadd.f32 %v316_v42, %v3271_v40 }
 0x122   :  { %v2334_v48 = vmul.f32 -1.442695, %v2725_v47 }
 0x123   :  { %2797 = vtanh.f32 %v2726_v43  ;;  %v2335_v58 = vmul.f32 -1.442695, %v2726_v43 }
 0x124   :  { %2799 = vpow2.f32 %v2334_v48 }
 0x12d   :  { %v2798_v44 = vpop.eup %2797 }
 0x12e   :  { %336 = vrot.lane.b32.xlu0 %v2798_v44, %s3042_s6  ;;  %v2800_v49 = vpop.eup %2799 }
 0x12f   :  { %v327_v50 = vadd.f32 1.0, %v2800_v49 }
 0x131   :  { %2801 = vrcp.f32 %v327_v50 }
 0x13b   :  { %v2802_v51 = vpop.eup %2801 }
 0x13c   :  { %v334_v54 = vmul.f32 0.0, %v2802_v51 }
 0x1a0   :  { %v337_v52 = vpop.permute.xlu0 %336 }
 0x1a1   :  { %v339_v53 = vmul.f32 %v2802_v51, %v337_v52 }
 0x1a3   :  { %341 = vrot.lane.b32.xlu0 %v339_v53, %s3042_s6 }
 0x215   :  { %v342_v55 = vpop.permute.xlu0 %341 }
 0x216   :  { %v344_v56 = vadd.f32 %v342_v55, %v334_v54 }
 0x218   :  { %2803 = vtanh.f32 %v344_v56 }
 0x219   :  { %2805 = vpow2.f32 %v2335_v58 }
 0x222   :  { %v2804_v57 = vpop.eup %2803 }
 0x223   :  { %347 = vrot.lane.b32.xlu1 %v2804_v57, %s3042_s6  ;;  %v2806_v59 = vpop.eup %2805 }
 0x224   :  { %v328_v60 = vadd.f32 1.0, %v2806_v59 }
 0x226   :  { %2807 = vrcp.f32 %v328_v60 }
 0x230   :  { %v2808_v61 = vpop.eup %2807 }
 0x295   :  { %v348_v62 = vpop.permute.xlu1 %347 }
 0x296   :  { %v3283_v63 = vmul.f32 %v2808_v61, %v348_v62 }
 0x298   :  { %2336 = vmatmul.mubr.msk.f32.vlgmr.msra.gmra.mrb[2].mxu0 %vm244_vm1, %v3283_v63 }
 0x299   :  { %2457 = vmatpush1.bf16.msra.mxu0 %v3158_v10  ;;  %524 = vmatprep.mubr.f32.mxu0 %v3041_v1 }
 0x29a   :  { %2459 = vmatprep.subr.bf16.mxu0 %v3174_v15 }
 0x29d   :  { %2461 = vmatpush1.bf16.msra.mxu0 %v3180_v17 }
 0x29e   :  { %2463 = vmatprep.subr.bf16.mxu0 %v3189_v20 }
 0x2a1   :  { %2465 = vmatpush1.bf16.msra.mxu0 %v3209_v26 }
 0x2a2   :  { %2467 = vmatprep.subr.bf16.mxu0 %v3212_v27 }
 0x2a5   :  { %2469 = vmatpush1.bf16.msra.mxu0 %v3226_v31 }
 0x2a6   :  { %2471 = vmatprep.subr.bf16.mxu0 %v3152_v8 }
 0x36b   :  { %v420_v0 = vpop.f32.mrb[2].mxu0 }
 0x36c   :  { %v422_v2 = vpop.f32.mrb[3].mxu0  ;;  %v2727_v5 = vadd.f32 %v420_v0, %v3278_v46 }
 0x36d   :  { %v2728_v3 = vadd.f32 %v422_v2, %v3271_v40 }
 0x36e   :  { %v2337_v6 = vmul.f32 -1.442695, %v2727_v5 }
 0x36f   :  { %2809 = vtanh.f32 %v2728_v3  ;;  %v2338_v21 = vmul.f32 -1.442695, %v2728_v3 }
 0x370   :  { %2811 = vpow2.f32 %v2337_v6 }
 0x379   :  { %v2810_v4 = vpop.eup %2809 }
 0x37a   :  { %442 = vrot.lane.b32.xlu1 %v2810_v4, %s3042_s6  ;;  %v2812_v7 = vpop.eup %2811 }
 0x37b   :  { %v433_v9 = vadd.f32 1.0, %v2812_v7 }
 0x37d   :  { %2813 = vrcp.f32 %v433_v9 }
 0x387   :  { %v2814_v11 = vpop.eup %2813 }
 0x388   :  { %v440_v14 = vmul.f32 %v2814_v11, %v344_v56 }
 0x3ec   :  { %v443_v12 = vpop.permute.xlu1 %442 }
 0x3ed   :  { %v445_v13 = vmul.f32 %v2814_v11, %v443_v12 }
 0x3ef   :  { %447 = vrot.lane.b32.xlu0 %v445_v13, %s3042_s6 }
 0x461   :  { %v448_v16 = vpop.permute.xlu0 %447 }
 0x462   :  { %v450_v18 = vadd.f32 %v448_v16, %v440_v14 }
 0x464   :  { %2815 = vtanh.f32 %v450_v18 }
 0x465   :  { %2817 = vpow2.f32 %v2338_v21 }
 0x46e   :  { %v2816_v19 = vpop.eup %2815 }
 0x46f   :  { %453 = vrot.lane.b32.xlu1 %v2816_v19, %s3042_s6  ;;  %v2818_v22 = vpop.eup %2817 }
 0x470   :  { %v434_v23 = vadd.f32 1.0, %v2818_v22 }
 0x472   :  { %2819 = vrcp.f32 %v434_v23 }
 0x47c   :  { %v2820_v24 = vpop.eup %2819 }
 0x4e1   :  { %v454_v25 = vpop.permute.xlu1 %453 }
 0x4e2   :  { %v3301_v28 = vmul.f32 %v2820_v24, %v454_v25 }
 0x4e4   :  { %2339 = vmatmul.mubr.msk.f32.vlgmr.msra.gmra.mrb[4].mxu0 %vm244_vm1, %v3301_v28 }
 0x4e5   :  { %2473 = vmatpush1.bf16.msra.mxu0 %v3158_v10  ;;  %630 = vmatprep.mubr.f32.mxu0 %v3041_v1 }
 0x4e6   :  { %2475 = vmatprep.subr.bf16.mxu0 %v3174_v15 }
 0x4e9   :  { %2477 = vmatpush1.bf16.msra.mxu0 %v3180_v17 }
 0x4ea   :  { %2479 = vmatprep.subr.bf16.mxu0 %v3189_v20 }
 0x4ed   :  { %2481 = vmatpush1.bf16.msra.mxu0 %v3209_v26 }
 0x4ee   :  { %2483 = vmatprep.subr.bf16.mxu0 %v3212_v27 }
 0x4f1   :  { %2485 = vmatpush1.bf16.msra.mxu0 %v3226_v31 }
 0x4f2   :  { %2487 = vmatprep.subr.bf16.mxu0 %v3152_v8 }
 0x5b7   :  { %v526_v29 = vpop.f32.mrb[4].mxu0 }
 0x5b8   :  { %v528_v30 = vpop.f32.mrb[5].mxu0  ;;  %v2729_v34 = vadd.f32 %v526_v29, %v3278_v46 }
 0x5b9   :  { %v2730_v32 = vadd.f32 %v528_v30, %v3271_v40 }
 0x5ba   :  { %v2340_v35 = vmul.f32 -1.442695, %v2729_v34 }
 0x5bb   :  { %2821 = vtanh.f32 %v2730_v32  ;;  %v2341_v50 = vmul.f32 -1.442695, %v2730_v32 }
 0x5bc   :  { %2823 = vpow2.f32 %v2340_v35 }
 0x5c5   :  { %v2822_v33 = vpop.eup %2821 }
 0x5c6   :  { %548 = vrot.lane.b32.xlu0 %v2822_v33, %s3042_s6  ;;  %v2824_v36 = vpop.eup %2823 }
 0x5c7   :  { %v539_v39 = vadd.f32 1.0, %v2824_v36 }
 0x5c9   :  { %2825 = vrcp.f32 %v539_v39 }
 0x5d3   :  { %v2826_v41 = vpop.eup %2825 }
 0x5d4   :  { %v546_v44 = vmul.f32 %v2826_v41, %v450_v18 }
 0x638   :  { %v549_v42 = vpop.permute.xlu0 %548 }
 0x639   :  { %v551_v43 = vmul.f32 %v2826_v41, %v549_v42 }
 0x63b   :  { %553 = vrot.lane.b32.xlu1 %v551_v43, %s3042_s6 }
 0x6ad   :  { %v554_v47 = vpop.permute.xlu1 %553 }
 0x6ae   :  { %v556_v48 = vadd.f32 %v554_v47, %v546_v44 }
 0x6b0   :  { %2827 = vtanh.f32 %v556_v48 }
 0x6b1   :  { %2829 = vpow2.f32 %v2341_v50 }
 0x6ba   :  { %v2828_v49 = vpop.eup %2827 }
 0x6bb   :  { %559 = vrot.lane.b32.xlu0 %v2828_v49, %s3042_s6  ;;  %v2830_v51 = vpop.eup %2829 }
 0x6bc   :  { %v540_v52 = vadd.f32 1.0, %v2830_v51 }
 0x6be   :  { %2831 = vrcp.f32 %v540_v52 }
 0x6c8   :  { %v2832_v53 = vpop.eup %2831 }
 0x72d   :  { %v560_v54 = vpop.permute.xlu0 %559 }
 0x72e   :  { %v3319_v55 = vmul.f32 %v2832_v53, %v560_v54 }
 0x730   :  { %2342 = vmatmul.mubr.msk.f32.vlgmr.msra.gmra.mrb[6].mxu0 %vm244_vm1, %v3319_v55 }
 0x731   :  { %2489 = vmatpush1.bf16.msra.mxu0 %v3158_v10  ;;  %736 = vmatprep.mubr.f32.mxu0 %v3041_v1 }
 0x732   :  { %2491 = vmatprep.subr.bf16.mxu0 %v3174_v15 }
 0x735   :  { %2493 = vmatpush1.bf16.msra.mxu0 %v3180_v17 }
 0x736   :  { %2495 = vmatprep.subr.bf16.mxu0 %v3189_v20 }
 0x739   :  { %2497 = vmatpush1.bf16.msra.mxu0 %v3209_v26 }
 0x73a   :  { %2499 = vmatprep.subr.bf16.mxu0 %v3212_v27 }
 0x73d   :  { %2501 = vmatpush1.bf16.msra.mxu0 %v3226_v31 }
 0x73e   :  { %2503 = vmatprep.subr.bf16.mxu0 %v3152_v8 }
 0x803   :  { %v632_v56 = vpop.f32.mrb[6].mxu0 }
 0x804   :  { %v634_v57 = vpop.f32.mrb[7].mxu0  ;;  %v2731_v60 = vadd.f32 %v632_v56, %v3278_v46 }
 0x805   :  { %v2732_v58 = vadd.f32 %v634_v57, %v3271_v40 }
 0x806   :  { %v2343_v61 = vmul.f32 -1.442695, %v2731_v60 }
 0x807   :  { %2833 = vtanh.f32 %v2732_v58  ;;  %v2344_v11 = vmul.f32 -1.442695, %v2732_v58 }
 0x808   :  { %2835 = vpow2.f32 %v2343_v61 }
 0x811   :  { %v2834_v59 = vpop.eup %2833 }
 0x812   :  { %654 = vrot.lane.b32.xlu1 %v2834_v59, %s3042_s6  ;;  %v2836_v62 = vpop.eup %2835 }
 0x813   :  { %v645_v0 = vadd.f32 1.0, %v2836_v62 }
 0x815   :  { %2837 = vrcp.f32 %v645_v0 }
 0x81f   :  { %v2838_v2 = vpop.eup %2837 }
 0x820   :  { %v652_v5 = vmul.f32 %v2838_v2, %v556_v48 }
 0x884   :  { %v655_v3 = vpop.permute.xlu1 %654 }
 0x885   :  { %v657_v4 = vmul.f32 %v2838_v2, %v655_v3 }
 0x887   :  { %659 = vrot.lane.b32.xlu0 %v657_v4, %s3042_s6 }
 0x8f9   :  { %v660_v6 = vpop.permute.xlu0 %659 }
 0x8fa   :  { %v662_v7 = vadd.f32 %v660_v6, %v652_v5 }
 0x8fc   :  { %2839 = vtanh.f32 %v662_v7 }
 0x8fd   :  { %2841 = vpow2.f32 %v2344_v11 }
 0x906   :  { %v2840_v9 = vpop.eup %2839 }
 0x907   :  { %665 = vrot.lane.b32.xlu1 %v2840_v9, %s3042_s6  ;;  %v2842_v12 = vpop.eup %2841 }
 0x908   :  { %v646_v13 = vadd.f32 1.0, %v2842_v12 }
 0x90a   :  { %2843 = vrcp.f32 %v646_v13 }
 0x914   :  { %v2844_v14 = vpop.eup %2843 }
 0x979   :  { %v666_v16 = vpop.permute.xlu1 %665 }
 0x97a   :  { %v3337_v18 = vmul.f32 %v2844_v14, %v666_v16 }
 0x97c   :  { %2345 = vmatmul.mubr.msk.f32.vlgmr.msra.gmra.mrb[8].mxu0 %vm244_vm1, %v3337_v18 }
 0x97d   :  { %2505 = vmatpush1.bf16.msra.mxu0 %v3158_v10  ;;  %842 = vmatprep.mubr.f32.mxu0 %v3041_v1 }
 0x97e   :  { %2507 = vmatprep.subr.bf16.mxu0 %v3174_v15 }
 0x981   :  { %2509 = vmatpush1.bf16.msra.mxu0 %v3180_v17 }
 0x982   :  { %2511 = vmatprep.subr.bf16.mxu0 %v3189_v20 }
 0x985   :  { %2513 = vmatpush1.bf16.msra.mxu0 %v3209_v26 }
 0x986   :  { %2515 = vmatprep.subr.bf16.mxu0 %v3212_v27 }
 0x989   :  { %2517 = vmatpush1.bf16.msra.mxu0 %v3226_v31 }
 0x98a   :  { %2519 = vmatprep.subr.bf16.mxu0 %v3152_v8 }
 0xa4f   :  { %v738_v19 = vpop.f32.mrb[8].mxu0 }
 0xa50   :  { %v740_v21 = vpop.f32.mrb[9].mxu0  ;;  %v2733_v24 = vadd.f32 %v738_v19, %v3278_v46 }
 0xa51   :  { %v2734_v22 = vadd.f32 %v740_v21, %v3271_v40 }
 0xa52   :  { %v2346_v25 = vmul.f32 -1.442695, %v2733_v24 }
 0xa53   :  { %2845 = vtanh.f32 %v2734_v22  ;;  %v2347_v42 = vmul.f32 -1.442695, %v2734_v22 }
 0xa54   :  { %2847 = vpow2.f32 %v2346_v25 }
 0xa5d   :  { %v2846_v23 = vpop.eup %2845 }
 0xa5e   :  { %760 = vrot.lane.b32.xlu0 %v2846_v23, %s3042_s6  ;;  %v2848_v29 = vpop.eup %2847 }
 0xa5f   :  { %v751_v30 = vadd.f32 1.0, %v2848_v29 }
 0xa61   :  { %2849 = vrcp.f32 %v751_v30 }
 0xa6b   :  { %v2850_v32 = vpop.eup %2849 }
 0xa6c   :  { %v758_v35 = vmul.f32 %v2850_v32, %v662_v7 }
 0xad0   :  { %v761_v33 = vpop.permute.xlu0 %760 }
 0xad1   :  { %v763_v34 = vmul.f32 %v2850_v32, %v761_v33 }
 0xad3   :  { %765 = vrot.lane.b32.xlu1 %v763_v34, %s3042_s6 }
 0xb45   :  { %v766_v36 = vpop.permute.xlu1 %765 }
 0xb46   :  { %v768_v39 = vadd.f32 %v766_v36, %v758_v35 }
 0xb48   :  { %2851 = vtanh.f32 %v768_v39 }
 0xb49   :  { %2853 = vpow2.f32 %v2347_v42 }
 0xb52   :  { %v2852_v41 = vpop.eup %2851 }
 0xb53   :  { %771 = vrot.lane.b32.xlu0 %v2852_v41, %s3042_s6  ;;  %v2854_v43 = vpop.eup %2853 }
 0xb54   :  { %v752_v44 = vadd.f32 1.0, %v2854_v43 }
 0xb56   :  { %2855 = vrcp.f32 %v752_v44 }
 0xb60   :  { %v2856_v47 = vpop.eup %2855 }
 0xbc5   :  { %v772_v48 = vpop.permute.xlu0 %771 }
 0xbc6   :  { %v3355_v49 = vmul.f32 %v2856_v47, %v772_v48 }
 0xbc8   :  { %2348 = vmatmul.mubr.msk.f32.vlgmr.msra.gmra.mrb[10].mxu0 %vm244_vm1, %v3355_v49 }
 0xbc9   :  { %2521 = vmatpush1.bf16.msra.mxu0 %v3158_v10  ;;  %948 = vmatprep.mubr.f32.mxu0 %v3041_v1 }
 0xbca   :  { %2523 = vmatprep.subr.bf16.mxu0 %v3174_v15 }
 0xbcd   :  { %2525 = vmatpush1.bf16.msra.mxu0 %v3180_v17 }
 0xbce   :  { %2527 = vmatprep.subr.bf16.mxu0 %v3189_v20 }
 0xbd1   :  { %2529 = vmatpush1.bf16.msra.mxu0 %v3209_v26 }
 0xbd2   :  { %2531 = vmatprep.subr.bf16.mxu0 %v3212_v27 }
 0xbd5   :  { %2533 = vmatpush1.bf16.msra.mxu0 %v3226_v31 }
 0xbd6   :  { %2535 = vmatprep.subr.bf16.mxu0 %v3152_v8 }
 0xc9b   :  { %v844_v50 = vpop.f32.mrb[10].mxu0 }
 0xc9c   :  { %v846_v51 = vpop.f32.mrb[11].mxu0  ;;  %v2735_v54 = vadd.f32 %v844_v50, %v3278_v46 }
 0xc9d   :  { %v2736_v52 = vadd.f32 %v846_v51, %v3271_v40 }
 0xc9e   :  { %v2349_v56 = vmul.f32 -1.442695, %v2735_v54  ;;  %v1129_v54 = vld [vmem:[#allocation3 + $0x18] sm:$0xff] }
 0xc9f   :  { %2857 = vtanh.f32 %v2736_v52  ;;  %v2350_v3 = vmul.f32 -1.442695, %v2736_v52 }
 0xca0   :  { %2859 = vpow2.f32 %v2349_v56 }
 0xca9   :  { %v2858_v53 = vpop.eup %2857 }
 0xcaa   :  { %866 = vrot.lane.b32.xlu1 %v2858_v53, %s3042_s6  ;;  %v2860_v57 = vpop.eup %2859  ;;  %v1127_v53 = vld [vmem:[#allocation3 + $0x8] sm:$0xff] }
 0xcab   :  { %v857_v58 = vadd.f32 1.0, %v2860_v57  ;;  %v2550_v56 = vpack.c.bf16 %v1129_v54, %v1127_v53  ;;  %v1128_v57 = vld [vmem:[#allocation3 + $0x10] sm:$0xff]  ;;  %v1286_v53 = vld [vmem:[#allocation5 + $0x18] sm:$0xff] }
 0xcad   :  { %2861 = vrcp.f32 %v857_v58  ;;  %v1131_v58 = vld [vmem:[#allocation3 + $0x28] sm:$0xff]  ;;  %2551 = vmatprep.subr.bf16.mxu1 %v2550_v56 }
 0xcb7   :  { %v2862_v59 = vpop.eup %2861 }
 0xcb8   :  { %v864_v8 = vmul.f32 %v2862_v59, %v768_v39 }
 0xd1c   :  { %v867_v60 = vpop.permute.xlu1 %866 }
 0xd1d   :  { %v869_v61 = vmul.f32 %v2862_v59, %v867_v60  ;;  %v1133_v59 = vld [vmem:[#allocation3 + $0x38] sm:$0xff] }
 0xd1f   :  { %871 = vrot.lane.b32.xlu0 %v869_v61, %s3042_s6  ;;  %v2554_v61 = vpack.c.bf16 %v1133_v59, %v1131_v58  ;;  %v1285_v58 = vld [vmem:[#allocation5 + $0x10] sm:$0xff]  ;;  %v1288_v59 = vld [vmem:[#allocation5 + $0x28] sm:$0xff] }
 0xd91   :  { %v872_v62 = vpop.permute.xlu0 %871 }
 0xd92   :  { %v874_v0 = vadd.f32 %v872_v62, %v864_v8  ;;  %v1130_v8 = vld [vmem:[#allocation3 + $0x20] sm:$0xff]  ;;  %v1132_v62 = vld [vmem:[#allocation3 + $0x30] sm:$0xff] }
 0xd94   :  { %2863 = vtanh.f32 %v874_v0 }
 0xd95   :  { %2865 = vpow2.f32 %v2350_v3  ;;  %v2556_v3 = vpack.c.bf16 %v1132_v62, %v1130_v8 }
 0xd9e   :  { %v2864_v2 = vpop.eup %2863 }
 0xd9f   :  { %877 = vrot.lane.b32.xlu1 %v2864_v2, %s3042_s6  ;;  %v2866_v4 = vpop.eup %2865  ;;  %v1137_v2 = vld [vmem:[#allocation3 + $0x58] sm:$0xff] }
 0xda0   :  { %v858_v5 = vadd.f32 1.0, %v2866_v4 }
 0xda2   :  { %2867 = vrcp.f32 %v858_v5  ;;  %v1134_v5 = vld [vmem:[#allocation3 + $0x40] sm:$0xff] }
 0xdac   :  { %v2868_v6 = vpop.eup %2867 }
 0xe11   :  { %v878_v7 = vpop.permute.xlu1 %877 }
 0xe12   :  { %v3373_v9 = vmul.f32 %v2868_v6, %v878_v7  ;;  %v1136_v6 = vld [vmem:[#allocation3 + $0x50] sm:$0xff]  ;;  %v1139_v7 = vld [vmem:[#allocation3 + $0x68] sm:$0xff] }
 0xe14   :  { %2351 = vmatmul.mubr.msk.f32.vlgmr.msra.gmra.mrb[12].mxu0 %vm244_vm1, %v3373_v9 }
 0xe15   :  { %2537 = vmatpush1.bf16.msra.mxu0 %v3158_v10  ;;  %1054 = vmatprep.mubr.f32.mxu0 %v3041_v1 }
 0xe16   :  { %2539 = vmatprep.subr.bf16.mxu0 %v3174_v15 }
 0xe19   :  { %2541 = vmatpush1.bf16.msra.mxu0 %v3180_v17 }
 0xe1a   :  { %2543 = vmatprep.subr.bf16.mxu0 %v3189_v20 }
 0xe1d   :  { %2545 = vmatpush1.bf16.msra.mxu0 %v3209_v26 }
 0xe1e   :  { %2547 = vmatprep.subr.bf16.mxu0 %v3212_v27 }
 0xe21   :  { %2549 = vmatpush1.bf16.msra.mxu0 %v3226_v31 }
 0xee7   :  { %v950_v11 = vpop.f32.mrb[12].mxu0 }
 0xee8   :  { %v952_v12 = vpop.f32.mrb[13].mxu0  ;;  %v2737_v15 = vadd.f32 %v950_v11, %v3278_v46  ;;  %v1141_v11 = vld [vmem:[#allocation3 + $0x78] sm:$0xff] }
 0xee9   :  { %v2738_v13 = vadd.f32 %v952_v12, %v3271_v40  ;;  %v2560_v12 = vpack.c.bf16 %v1136_v6, %v1134_v5  ;;  %v1294_v5 = vld [vmem:[#allocation5 + $0x58] sm:$0xff] }
 0xeea   :  { %v2352_v14 = vmul.f32 -1.442695, %v2737_v15  ;;  %v1140_v15 = vld [vmem:[#allocation3 + $0x70] sm:$0xff] }
 0xeeb   :  { %2869 = vtanh.f32 %v2738_v13  ;;  %v2353_v23 = vmul.f32 -1.442695, %v2738_v13  ;;  %v2562_v13 = vpack.c.bf16 %v1141_v11, %v1139_v7 }
 0xeec   :  { %2871 = vpow2.f32 %v2352_v14  ;;  %v1143_v14 = vld [vmem:[#allocation3 + $0x88] sm:$0xff] }
 0xef5   :  { %v2870_v10 = vpop.eup %2869 }
 0xef6   :  { %972 = vrot.lane.b32.xlu0 %v2870_v10, %s3042_s6  ;;  %v2872_v17 = vpop.eup %2871  ;;  %v1138_v10 = vld [vmem:[#allocation3 + $0x60] sm:$0xff] }
 0xef7   :  { %v963_v20 = vadd.f32 1.0, %v2872_v17  ;;  %v1145_v17 = vld [vmem:[#allocation3 + $0x98] sm:$0xff] }
 0xef9   :  { %2873 = vrcp.f32 %v963_v20  ;;  %v2564_v20 = vpack.c.bf16 %v1140_v15, %v1138_v10  ;;  %v1298_v15 = vld [vmem:[#allocation5 + $0x78] sm:$0xff] }
 0xf03   :  { %v2874_v26 = vpop.eup %2873 }
 0xf04   :  { %v970_v31 = vmul.f32 %v2874_v26, %v874_v0  ;;  %v1135_v0 = vld [vmem:[#allocation3 + $0x48] sm:$0xff] }
 0xf05   :  { %v2558_v4 = vpack.c.bf16 %v1137_v2, %v1135_v0  ;;  %v1287_v0 = vld [vmem:[#allocation5 + $0x20] sm:$0xff]  ;;  %v1289_v2 = vld [vmem:[#allocation5 + $0x30] sm:$0xff] }
 0xf06   :  { %v3432_v7 = vpack.c.bf16 %v1289_v2, %v1287_v0 }
 0xf68   :  { %v973_v16 = vpop.permute.xlu0 %972 }
 0xf69   :  { %v975_v27 = vmul.f32 %v2874_v26, %v973_v16  ;;  %v2566_v26 = vpack.c.bf16 %v1145_v17, %v1143_v14  ;;  %v1142_v16 = vld [vmem:[#allocation3 + $0x80] sm:$0xff] }
 0xf6b   :  { %977 = vrot.lane.b32.xlu1 %v975_v27, %s3042_s6  ;;  %v1144_v27 = vld [vmem:[#allocation3 + $0x90] sm:$0xff] }
 0xfdd   :  { %v978_v19 = vpop.permute.xlu1 %977 }
 0xfde   :  { %v980_v21 = vadd.f32 %v978_v19, %v970_v31  ;;  %v1147_v31 = vld [vmem:[#allocation3 + $0xa8] sm:$0xff]  ;;  %v1149_v19 = vld [vmem:[#allocation3 + $0xb8] sm:$0xff] }
 0xfe0   :  { %2875 = vtanh.f32 %v980_v21 }
 0xfe1   :  { %2877 = vpow2.f32 %v2353_v23  ;;  %v1146_v23 = vld [vmem:[#allocation3 + $0xa0] sm:$0xff] }
 0xfea   :  { %v2876_v22 = vpop.eup %2875 }
 0xfeb   :  { %983 = vrot.lane.b32.xlu0 %v2876_v22, %s3042_s6  ;;  %v2878_v24 = vpop.eup %2877  ;;  %v2570_v22 = vpack.c.bf16 %v1149_v19, %v1147_v31 }
 0xfec   :  { %v964_v25 = vadd.f32 1.0, %v2878_v24  ;;  %v1148_v24 = vld [vmem:[#allocation3 + $0xb0] sm:$0xff] }
 0xfee   :  { %2879 = vrcp.f32 %v964_v25  ;;  %v1151_v25 = vld [vmem:[#allocation3 + $0xc8] sm:$0xff] }
 0xff8   :  { %v2880_v29 = vpop.eup %2879 }
0x105d   :  { %v984_v30 = vpop.permute.xlu0 %983 }
0x105e   :  { %v3390_v32 = vmul.f32 %v2880_v29, %v984_v30  ;;  %v1153_v29 = vld [vmem:[#allocation3 + $0xd8] sm:$0xff]  ;;  %v2572_v30 = vpack.c.bf16 %v1148_v24, %v1146_v23 }
0x1060   :  { %2354 = vmatmul.mubr.msk.f32.vlgmr.msra.gmra.mrb[14].mxu0 %vm244_vm1, %v3390_v32 }
0x1061   :  { %2412 = vmatprep.mubr.msk.f32.mxu0 %vm3044_vm2, %v3041_v1 }
0x1133   :  { %v1056_v33 = vpop.f32.mrb[14].mxu0 }
0x1134   :  { %v1058_v34 = vpop.f32.mrb[15].mxu0  ;;  %v2739_v39 = vadd.f32 %v1056_v33, %v3278_v46  ;;  %v1126_v46 = vld [vmem:[#allocation3] sm:$0xff]  ;;  %v2574_v33 = vpack.c.bf16 %v1153_v29, %v1151_v25 }
0x1135   :  { %v3395_v35 = vadd.f32 %v1058_v34, %v3271_v40  ;;  %v2552_v60 = vpack.c.bf16 %v1128_v57, %v1126_v46  ;;  %v1150_v34 = vld [vmem:[#allocation3 + $0xc0] sm:$0xff] }
0x1136   :  { %v2355_v41 = vmul.f32 -1.442695, %v2739_v39  ;;  %v1155_v39 = vld [vmem:[#allocation3 + $0xe8] sm:$0xff] }
0x1137   :  { %2881 = vtanh.f32 %v3395_v35  ;;  %2553 = vmatpush1.bf16.msra.mxu1 %v2552_v60  ;;  %v1290_v60 = vld [vmem:[#allocation5 + $0x38] sm:$0xff] }
0x1138   :  { %2883 = vpow2.f32 %v2355_v41  ;;  %2555 = vmatprep.subr.bf16.mxu1 %v2554_v61  ;;  %v1157_v41 = vld [vmem:[#allocation3 + $0xf8] sm:$0xff]  ;;  %v3426_v62 = vpack.c.bf16 %v1290_v60, %v1288_v59 }
0x113b   :  { %2557 = vmatpush1.bf16.msra.mxu1 %v2556_v3 }
0x113c   :  { %2559 = vmatprep.subr.bf16.mxu1 %v2558_v4  ;;  %v1292_v4 = vld [vmem:[#allocation5 + $0x48] sm:$0xff] }
0x113d   :  { %v3435_v11 = vpack.c.bf16 %v1294_v5, %v1292_v4 }
0x113f   :  { %2561 = vmatpush1.bf16.msra.mxu1 %v2560_v12  ;;  %v1291_v12 = vld [vmem:[#allocation5 + $0x40] sm:$0xff] }
0x1140   :  { %2563 = vmatprep.subr.bf16.mxu1 %v2562_v13  ;;  %v1293_v13 = vld [vmem:[#allocation5 + $0x50] sm:$0xff] }
0x1141   :  { %v2882_v36 = vpop.eup %2881  ;;  %v3441_v17 = vpack.c.bf16 %v1293_v13, %v1291_v12 }
0x1142   :  { %1078 = vrot.lane.b32.xlu1 %v2882_v36, %s3042_s6  ;;  %v2884_v42 = vpop.eup %2883  ;;  %v1152_v36 = vld [vmem:[#allocation3 + $0xd0] sm:$0xff] }
0x1143   :  { %v1069_v43 = vadd.f32 1.0, %v2884_v42  ;;  %2565 = vmatpush1.bf16.msra.mxu1 %v2564_v20  ;;  %v2576_v42 = vpack.c.bf16 %v1152_v36, %v1150_v34 }
0x1144   :  { %2567 = vmatprep.subr.bf16.mxu1 %v2566_v26  ;;  %v1295_v26 = vld [vmem:[#allocation5 + $0x60] sm:$0xff] }
0x1145   :  { %2885 = vrcp.f32 %v1069_v43  ;;  %v2578_v43 = vpack.c.bf16 %v1157_v41, %v1155_v39 }
0x114f   :  { %v2886_v44 = vpop.eup %2885 }
0x1150   :  { %v1076_v50 = vmul.f32 %v2886_v44, %v980_v21  ;;  %v2568_v21 = vpack.c.bf16 %v1144_v27, %v1142_v16  ;;  %v1297_v16 = vld [vmem:[#allocation5 + $0x70] sm:$0xff] }
0x1151   :  { %v3450_v31 = vpack.c.bf16 %v1297_v16, %v1295_v26 }
0x1152   :  { %2569 = vmatpush1.bf16.msra.mxu1 %v2568_v21 }
0x1153   :  { %2571 = vmatprep.subr.bf16.mxu1 %v2570_v22 }
0x1156   :  { %2573 = vmatpush1.bf16.msra.mxu1 %v2572_v30 }
0x1157   :  { %2575 = vmatprep.subr.bf16.mxu1 %v2574_v33 }
0x115a   :  { %2577 = vmatpush1.bf16.msra.mxu1 %v2576_v42 }
0x115b   :  { %2579 = vmatprep.subr.bf16.mxu1 %v2578_v43 }
0x11b4   :  { %v1079_v47 = vpop.permute.xlu1 %1078 }
0x11b5   :  { %v1081_v48 = vmul.f32 %v2886_v44, %v1079_v47  ;;  %v1154_v44 = vld [vmem:[#allocation3 + $0xe0] sm:$0xff]  ;;  %v1156_v47 = vld [vmem:[#allocation3 + $0xf0] sm:$0xff] }
0x11b7   :  { %1083 = vrot.lane.b32.xlu0 %v1081_v48, %s3042_s6  ;;  %v2580_v48 = vpack.c.bf16 %v1156_v47, %v1154_v44 }
0x11b9   :  { %2581 = vmatpush1.bf16.msra.mxu1 %v2580_v48 }
0x1229   :  { %v1084_v40 = vpop.permute.xlu0 %1083 }
0x122a   :  { %v1086_v51 = vadd.f32 %v1084_v40, %v1076_v50  ;;  %v2356_v50 = vmul.f32 -1.442695, %v3395_v35  ;;  %v1283_v35 = vld [vmem:[#allocation5] sm:$0xff] }
0x122b   :  { %v3424_v61 = vpack.c.bf16 %v1285_v58, %v1283_v35 }
0x122c   :  { %2887 = vtanh.f32 %v1086_v51 }
0x122d   :  { %2889 = vpow2.f32 %v2356_v50 }
0x1236   :  { %v2888_v52 = vpop.eup %2887 }
0x1237   :  { %1089 = vrot.lane.b32.xlu1 %v2888_v52, %s3042_s6  ;;  %v2890_v40 = vpop.eup %2889  ;;  %v1284_v52 = vld [vmem:[#allocation5 + $0x8] sm:$0xff] }
0x1238   :  { %v1070_v51 = vadd.f32 1.0, %v2890_v40  ;;  %v3411_v54 = vpack.c.bf16 %v1286_v53, %v1284_v52 }
0x123a   :  { %2891 = vrcp.f32 %v1070_v51  ;;  %2583 = vmatprep.subr.bf16.mxu1 %v3411_v54 }
0x123b   :  { %1098 = vrot.lane.b32.xlu1 %v3390_v32, %s3042_s6 }
0x123f   :  { %1106 = vrot.lane.b32.xlu1 %v3355_v49, %s3042_s6 }
0x1243   :  { %1114 = vrot.lane.b32.xlu1 %v3319_v55, %s3042_s6 }
0x1244   :  { %v2892_v46 = vpop.eup %2891 }
0x1247   :  { %1122 = vrot.lane.b32.xlu1 %v3283_v63, %s3042_s6 }
0x12a9   :  { %v1090_v56 = vpop.permute.xlu1 %1089 }
0x12aa   :  { %v3414_v57 = vmul.f32 %v2892_v46, %v1090_v56 }
0x12ac   :  { %1094 = vrot.lane.b32.xlu0 %v3414_v57, %s3042_s6 }
0x12ad   :  { %v1099_v6 = vpop.permute.xlu1 %1098 }
0x12ae   :  { %v1101_v10 = vsel %vm244_vm1, %v3301_v28, %v1099_v6 }
0x12b0   :  { %1102 = vrot.lane.b32.xlu0 %v3373_v9, %s3042_s6 }
0x12b4   :  { %1110 = vrot.lane.b32.xlu0 %v3337_v18, %s3042_s6 }
0x12b8   :  { %1118 = vrot.lane.b32.xlu0 %v3301_v28, %s3042_s6  ;;  %v1107_v28 = vpop.permute.xlu1 %1106 }
0x12b9   :  { %v1109_v19 = vsel %vm244_vm1, %v3337_v18, %v1107_v28 }
0x12bc   :  { %v1115_v22 = vpop.permute.xlu1 %1114 }
0x12bd   :  { %v1117_v23 = vsel %vm244_vm1, %v3373_v9, %v1115_v22  ;;  %v1158_v9 = vld [vmem:[%s3635_s5] sm:$0x3] }
0x12be   :  { %v3491_v36 = vrot.slane %v1158_v9, %v82_v45 }
0x12c0   :  { %v1123_v25 = vpop.permute.xlu1 %1122 }
0x131e   :  { %v1095_v8 = vpop.permute.xlu0 %1094 }
0x131f   :  { %v1097_v3 = vsel %vm244_vm1, %v3283_v63, %v1095_v8  ;;  %v1296_v63 = vld [vmem:[#allocation5 + $0x68] sm:$0xff] }
0x1320   :  { %1235 = vmatmul.mubr.f32.vlgmr.msra.gmra.mrb[0].mxu1 %v1097_v3  ;;  %v3444_v20 = vpack.c.bf16 %v1298_v15, %v1296_v63 }
0x1321   :  { %2585 = vmatpush1.bf16.msra.mxu1 %v3424_v61  ;;  %1240 = vmatprep.mubr.f32.mxu1 %v3041_v1 }
0x1322   :  { %2587 = vmatprep.subr.bf16.mxu1 %v3426_v62  ;;  %v1103_v14 = vpop.permute.xlu0 %1102 }
0x1323   :  { %v1105_v27 = vsel %vm244_vm1, %v3319_v55, %v1103_v14 }
0x1324   :  { %1241 = vmatmul.mubr.f32.gmra.mrb[2].mxu1 %v1101_v10 }
0x1325   :  { %1246 = vmatprep.mubr.f32.mxu1 %v3041_v1  ;;  %2589 = vmatpush1.bf16.msra.mxu1 %v3432_v7 }
0x1326   :  { %2591 = vmatprep.subr.bf16.mxu1 %v3435_v11  ;;  %v1111_v21 = vpop.permute.xlu0 %1110 }
0x1327   :  { %v1113_v55 = vsel %vm244_vm1, %v3355_v49, %v1111_v21  ;;  %v1125_v49 = vsel %vm244_vm1, %v3414_v57, %v1123_v25 }
0x1328   :  { %1247 = vmatmul.mubr.f32.gmra.mrb[4].mxu1 %v1105_v27 }
0x1329   :  { %1252 = vmatprep.mubr.f32.mxu1 %v3041_v1  ;;  %2593 = vmatpush1.bf16.msra.mxu1 %v3441_v17 }
0x132a   :  { %2595 = vmatprep.subr.bf16.mxu1 %v3444_v20  ;;  %v1119_v24 = vpop.permute.xlu0 %1118 }
0x132b   :  { %v1121_v18 = vsel %vm244_vm1, %v3390_v32, %v1119_v24  ;;  %v3485_v32 = vrot.slane %v1158_v9, %v86_v38 }
0x132c   :  { %1253 = vmatmul.mubr.f32.gmra.mrb[6].mxu1 %v1109_v19 }
0x132d   :  { %1258 = vmatprep.mubr.f32.mxu1 %v3041_v1  ;;  %2597 = vmatpush1.bf16.msra.mxu1 %v3450_v31 }
0x132e   :  { %2599 = vmatprep.subr.bf16.mxu1 %v3411_v54 }
0x1330   :  { %1259 = vmatmul.mubr.f32.gmra.mrb[8].mxu1 %v1113_v55 }
0x1331   :  { %1264 = vmatprep.mubr.f32.mxu1 %v3041_v1 }
0x1334   :  { %1265 = vmatmul.mubr.f32.gmra.mrb[10].mxu1 %v1117_v23 }
0x1335   :  { %1270 = vmatprep.mubr.f32.mxu1 %v3041_v1 }
0x1338   :  { %1271 = vmatmul.mubr.f32.gmra.mrb[12].mxu1 %v1121_v18 }
0x1339   :  { %1276 = vmatprep.mubr.f32.mxu1 %v3041_v1 }
0x133c   :  { %1277 = vmatmul.mubr.f32.gmra.mrb[14].mxu1 %v1125_v49 }
0x133d   :  { %1363 = vmatprep.mubr.f32.mxu1 %v3041_v1 }
0x1340   :  { %1364 = vmatmul.mubr.f32.vlgmr.msra.gmra.mrb[0].mxu1 %v3041_v1 }
0x1341   :  { %2601 = vmatpush1.bf16.msra.mxu1 %v3424_v61  ;;  %1469 = vmatprep.mubr.f32.mxu1 %v3041_v1 }
0x1342   :  { %2603 = vmatprep.subr.bf16.mxu1 %v3426_v62 }
0x1345   :  { %2605 = vmatpush1.bf16.msra.mxu1 %v3432_v7 }
0x1346   :  { %2607 = vmatprep.subr.bf16.mxu1 %v3435_v11 }
0x1349   :  { %2609 = vmatpush1.bf16.msra.mxu1 %v3441_v17 }
0x134a   :  { %2611 = vmatprep.subr.bf16.mxu1 %v3444_v20 }
0x134d   :  { %2613 = vmatpush1.bf16.msra.mxu1 %v3450_v31 }
0x134e   :  { %2615 = vmatprep.subr.bf16.mxu1 %v3411_v54 }
0x1413   :  { %v1365_v29 = vpop.f32.mrb[0].mxu1 }
0x1414   :  { %v1367_v30 = vpop.f32.mrb[1].mxu1  ;;  %v2741_v39 = vadd.f32 %v1365_v29, %v3491_v36 }
0x1415   :  { %v2742_v33 = vadd.f32 %v1367_v30, %v3485_v32 }
0x1416   :  { %v2357_v41 = vmul.f32 -1.442695, %v2741_v39 }
0x1417   :  { %2893 = vtanh.f32 %v2742_v33  ;;  %v2358_v37 = vmul.f32 -1.442695, %v2742_v33 }
0x1418   :  { %2895 = vpow2.f32 %v2357_v41 }
0x1421   :  { %v2894_v34 = vpop.eup %2893 }
0x1422   :  { %1387 = vrot.lane.b32.xlu0 %v2894_v34, %s3042_s6  ;;  %v2896_v42 = vpop.eup %2895 }
0x1423   :  { %v1378_v43 = vadd.f32 1.0, %v2896_v42 }
0x1425   :  { %2897 = vrcp.f32 %v1378_v43 }
0x142f   :  { %v2898_v38 = vpop.eup %2897 }
0x1430   :  { %v1385_v48 = vmul.f32 0.0, %v2898_v38 }
0x1494   :  { %v1388_v44 = vpop.permute.xlu0 %1387 }
0x1495   :  { %v1390_v47 = vmul.f32 %v2898_v38, %v1388_v44 }
0x1497   :  { %1392 = vrot.lane.b32.xlu1 %v1390_v47, %s3042_s6 }
0x1509   :  { %v1393_v50 = vpop.permute.xlu1 %1392 }
0x150a   :  { %v1395_v40 = vadd.f32 %v1393_v50, %v1385_v48 }
0x150c   :  { %2899 = vtanh.f32 %v1395_v40 }
0x150d   :  { %2901 = vpow2.f32 %v2358_v37 }
0x1516   :  { %v2900_v51 = vpop.eup %2899 }
0x1517   :  { %1398 = vrot.lane.b32.xlu0 %v2900_v51, %s3042_s6  ;;  %v2902_v45 = vpop.eup %2901 }
0x1518   :  { %v1379_v52 = vadd.f32 1.0, %v2902_v45 }
0x151a   :  { %2903 = vrcp.f32 %v1379_v52 }
0x1524   :  { %v2904_v53 = vpop.eup %2903 }
0x1589   :  { %v1399_v46 = vpop.permute.xlu0 %1398 }
0x158a   :  { %v1401_v56 = vmul.f32 %v2904_v53, %v1399_v46 }
0x158c   :  { %2359 = vmatmul.mubr.msk.f32.vlgmr.msra.gmra.mrb[2].mxu1 %vm244_vm1, %v1401_v56 }
0x158d   :  { %2617 = vmatpush1.bf16.msra.mxu1 %v3424_v61  ;;  %1575 = vmatprep.mubr.f32.mxu1 %v3041_v1 }
0x158e   :  { %2619 = vmatprep.subr.bf16.mxu1 %v3426_v62 }
0x1591   :  { %2621 = vmatpush1.bf16.msra.mxu1 %v3432_v7 }
0x1592   :  { %2623 = vmatprep.subr.bf16.mxu1 %v3435_v11 }
0x1595   :  { %2625 = vmatpush1.bf16.msra.mxu1 %v3441_v17 }
0x1596   :  { %2627 = vmatprep.subr.bf16.mxu1 %v3444_v20 }
0x1599   :  { %2629 = vmatpush1.bf16.msra.mxu1 %v3450_v31 }
0x159a   :  { %2631 = vmatprep.subr.bf16.mxu1 %v3411_v54 }
0x165f   :  { %v1471_v57 = vpop.f32.mrb[2].mxu1 }
0x1660   :  { %v1473_v35 = vpop.f32.mrb[3].mxu1  ;;  %v2743_v60 = vadd.f32 %v1471_v57, %v3491_v36 }
0x1661   :  { %v2744_v58 = vadd.f32 %v1473_v35, %v3485_v32 }
0x1662   :  { %v2360_v8 = vmul.f32 -1.442695, %v2743_v60 }
0x1663   :  { %2905 = vtanh.f32 %v2744_v58  ;;  %v2361_v63 = vmul.f32 -1.442695, %v2744_v58 }
0x1664   :  { %2907 = vpow2.f32 %v2360_v8 }
0x166d   :  { %v2906_v59 = vpop.eup %2905 }
0x166e   :  { %1493 = vrot.lane.b32.xlu1 %v2906_v59, %s3042_s6  ;;  %v2908_v0 = vpop.eup %2907 }
0x166f   :  { %v1484_v2 = vadd.f32 1.0, %v2908_v0 }
0x1671   :  { %2909 = vrcp.f32 %v1484_v2 }
0x167b   :  { %v2910_v3 = vpop.eup %2909 }
0x167c   :  { %v1491_v6 = vmul.f32 %v2910_v3, %v1395_v40 }
0x16e0   :  { %v1494_v4 = vpop.permute.xlu1 %1493 }
0x16e1   :  { %v1496_v5 = vmul.f32 %v2910_v3, %v1494_v4 }
0x16e3   :  { %1498 = vrot.lane.b32.xlu0 %v1496_v5, %s3042_s6 }
0x1755   :  { %v1499_v12 = vpop.permute.xlu0 %1498 }
0x1756   :  { %v1501_v13 = vadd.f32 %v1499_v12, %v1491_v6 }
0x1758   :  { %2911 = vtanh.f32 %v1501_v13 }
0x1759   :  { %2913 = vpow2.f32 %v2361_v63 }
0x1762   :  { %v2912_v10 = vpop.eup %2911 }
0x1763   :  { %1504 = vrot.lane.b32.xlu1 %v2912_v10, %s3042_s6  ;;  %v2914_v15 = vpop.eup %2913 }
0x1764   :  { %v1485_v14 = vadd.f32 1.0, %v2914_v15 }
0x1766   :  { %2915 = vrcp.f32 %v1485_v14 }
0x1770   :  { %v2916_v26 = vpop.eup %2915 }
0x17d5   :  { %v1505_v16 = vpop.permute.xlu1 %1504 }
0x17d6   :  { %v1507_v27 = vmul.f32 %v2916_v26, %v1505_v16 }
0x17d8   :  { %2362 = vmatmul.mubr.msk.f32.vlgmr.msra.gmra.mrb[4].mxu1 %vm244_vm1, %v1507_v27 }
0x17d9   :  { %2633 = vmatpush1.bf16.msra.mxu1 %v3424_v61  ;;  %1681 = vmatprep.mubr.f32.mxu1 %v3041_v1 }
0x17da   :  { %2635 = vmatprep.subr.bf16.mxu1 %v3426_v62 }
0x17dd   :  { %2637 = vmatpush1.bf16.msra.mxu1 %v3432_v7 }
0x17de   :  { %2639 = vmatprep.subr.bf16.mxu1 %v3435_v11 }
0x17e1   :  { %2641 = vmatpush1.bf16.msra.mxu1 %v3441_v17 }
0x17e2   :  { %2643 = vmatprep.subr.bf16.mxu1 %v3444_v20 }
0x17e5   :  { %2645 = vmatpush1.bf16.msra.mxu1 %v3450_v31 }
0x17e6   :  { %2647 = vmatprep.subr.bf16.mxu1 %v3411_v54 }
0x18ab   :  { %v1577_v28 = vpop.f32.mrb[4].mxu1 }
0x18ac   :  { %v1579_v19 = vpop.f32.mrb[5].mxu1  ;;  %v2745_v22 = vadd.f32 %v1577_v28, %v3491_v36 }
0x18ad   :  { %v2746_v21 = vadd.f32 %v1579_v19, %v3485_v32 }
0x18ae   :  { %v2363_v23 = vmul.f32 -1.442695, %v2745_v22 }
0x18af   :  { %2917 = vtanh.f32 %v2746_v21  ;;  %v2364_v39 = vmul.f32 -1.442695, %v2746_v21 }
0x18b0   :  { %2919 = vpow2.f32 %v2363_v23 }
0x18b9   :  { %v2918_v55 = vpop.eup %2917 }
0x18ba   :  { %1599 = vrot.lane.b32.xlu0 %v2918_v55, %s3042_s6  ;;  %v2920_v24 = vpop.eup %2919 }
0x18bb   :  { %v1590_v18 = vadd.f32 1.0, %v2920_v24 }
0x18bd   :  { %2921 = vrcp.f32 %v1590_v18 }
0x18c7   :  { %v2922_v25 = vpop.eup %2921 }
0x18c8   :  { %v1597_v29 = vmul.f32 %v2922_v25, %v1501_v13 }
0x192c   :  { %v1600_v49 = vpop.permute.xlu0 %1599 }
0x192d   :  { %v1602_v9 = vmul.f32 %v2922_v25, %v1600_v49 }
0x192f   :  { %1604 = vrot.lane.b32.xlu1 %v1602_v9, %s3042_s6 }
0x19a1   :  { %v1605_v30 = vpop.permute.xlu1 %1604 }
0x19a2   :  { %v1607_v33 = vadd.f32 %v1605_v30, %v1597_v29 }
0x19a4   :  { %2923 = vtanh.f32 %v1607_v33 }
0x19a5   :  { %2925 = vpow2.f32 %v2364_v39 }
0x19ae   :  { %v2924_v34 = vpop.eup %2923 }
0x19af   :  { %1610 = vrot.lane.b32.xlu0 %v2924_v34, %s3042_s6  ;;  %v2926_v41 = vpop.eup %2925 }
0x19b0   :  { %v1591_v42 = vadd.f32 1.0, %v2926_v41 }
0x19b2   :  { %2927 = vrcp.f32 %v1591_v42 }
0x19bc   :  { %v2928_v43 = vpop.eup %2927 }
0x1a21   :  { %v1611_v38 = vpop.permute.xlu0 %1610 }
0x1a22   :  { %v1613_v44 = vmul.f32 %v2928_v43, %v1611_v38 }
0x1a24   :  { %2365 = vmatmul.mubr.msk.f32.vlgmr.msra.gmra.mrb[6].mxu1 %vm244_vm1, %v1613_v44 }
0x1a25   :  { %2649 = vmatpush1.bf16.msra.mxu1 %v3424_v61  ;;  %1787 = vmatprep.mubr.f32.mxu1 %v3041_v1 }
0x1a26   :  { %2651 = vmatprep.subr.bf16.mxu1 %v3426_v62 }
0x1a29   :  { %2653 = vmatpush1.bf16.msra.mxu1 %v3432_v7 }
0x1a2a   :  { %2655 = vmatprep.subr.bf16.mxu1 %v3435_v11 }
0x1a2d   :  { %2657 = vmatpush1.bf16.msra.mxu1 %v3441_v17 }
0x1a2e   :  { %2659 = vmatprep.subr.bf16.mxu1 %v3444_v20 }
0x1a31   :  { %2661 = vmatpush1.bf16.msra.mxu1 %v3450_v31 }
0x1a32   :  { %2663 = vmatprep.subr.bf16.mxu1 %v3411_v54 }
0x1af7   :  { %v1683_v47 = vpop.f32.mrb[6].mxu1 }
0x1af8   :  { %v1685_v48 = vpop.f32.mrb[7].mxu1  ;;  %v2747_v51 = vadd.f32 %v1683_v47, %v3491_v36 }
0x1af9   :  { %v2748_v50 = vadd.f32 %v1685_v48, %v3485_v32 }
0x1afa   :  { %v2366_v37 = vmul.f32 -1.442695, %v2747_v51 }
0x1afb   :  { %2929 = vtanh.f32 %v2748_v50  ;;  %v2367_v60 = vmul.f32 -1.442695, %v2748_v50 }
0x1afc   :  { %2931 = vpow2.f32 %v2366_v37 }
0x1b05   :  { %v2930_v40 = vpop.eup %2929 }
0x1b06   :  { %1705 = vrot.lane.b32.xlu1 %v2930_v40, %s3042_s6  ;;  %v2932_v45 = vpop.eup %2931 }
0x1b07   :  { %v1696_v52 = vadd.f32 1.0, %v2932_v45 }
0x1b09   :  { %2933 = vrcp.f32 %v1696_v52 }
0x1b13   :  { %v2934_v53 = vpop.eup %2933 }
0x1b14   :  { %v1703_v57 = vmul.f32 %v2934_v53, %v1607_v33 }
0x1b78   :  { %v1706_v46 = vpop.permute.xlu1 %1705 }
0x1b79   :  { %v1708_v56 = vmul.f32 %v2934_v53, %v1706_v46 }
0x1b7b   :  { %1710 = vrot.lane.b32.xlu0 %v1708_v56, %s3042_s6 }
0x1bed   :  { %v1711_v35 = vpop.permute.xlu0 %1710 }
0x1bee   :  { %v1713_v58 = vadd.f32 %v1711_v35, %v1703_v57 }
0x1bf0   :  { %2935 = vtanh.f32 %v1713_v58 }
0x1bf1   :  { %2937 = vpow2.f32 %v2367_v60 }
0x1bfa   :  { %v2936_v59 = vpop.eup %2935 }
0x1bfb   :  { %1716 = vrot.lane.b32.xlu1 %v2936_v59, %s3042_s6  ;;  %v2938_v8 = vpop.eup %2937 }
0x1bfc   :  { %v1697_v0 = vadd.f32 1.0, %v2938_v8 }
0x1bfe   :  { %2939 = vrcp.f32 %v1697_v0 }
0x1c08   :  { %v2940_v2 = vpop.eup %2939 }
0x1c6d   :  { %v1717_v3 = vpop.permute.xlu1 %1716 }
0x1c6e   :  { %v1719_v4 = vmul.f32 %v2940_v2, %v1717_v3 }
0x1c70   :  { %2368 = vmatmul.mubr.msk.f32.vlgmr.msra.gmra.mrb[8].mxu1 %vm244_vm1, %v1719_v4 }
0x1c71   :  { %2665 = vmatpush1.bf16.msra.mxu1 %v3424_v61  ;;  %1893 = vmatprep.mubr.f32.mxu1 %v3041_v1 }
0x1c72   :  { %2667 = vmatprep.subr.bf16.mxu1 %v3426_v62 }
0x1c75   :  { %2669 = vmatpush1.bf16.msra.mxu1 %v3432_v7 }
0x1c76   :  { %2671 = vmatprep.subr.bf16.mxu1 %v3435_v11 }
0x1c79   :  { %2673 = vmatpush1.bf16.msra.mxu1 %v3441_v17 }
0x1c7a   :  { %2675 = vmatprep.subr.bf16.mxu1 %v3444_v20 }
0x1c7d   :  { %2677 = vmatpush1.bf16.msra.mxu1 %v3450_v31 }
0x1c7e   :  { %2679 = vmatprep.subr.bf16.mxu1 %v3411_v54 }
0x1d43   :  { %v1789_v5 = vpop.f32.mrb[8].mxu1 }
0x1d44   :  { %v1791_v6 = vpop.f32.mrb[9].mxu1  ;;  %v2749_v10 = vadd.f32 %v1789_v5, %v3491_v36 }
0x1d45   :  { %v2750_v12 = vadd.f32 %v1791_v6, %v3485_v32 }
0x1d46   :  { %v2369_v63 = vmul.f32 -1.442695, %v2749_v10 }
0x1d47   :  { %2941 = vtanh.f32 %v2750_v12  ;;  %v2370_v22 = vmul.f32 -1.442695, %v2750_v12 }
0x1d48   :  { %2943 = vpow2.f32 %v2369_v63 }
0x1d51   :  { %v2942_v13 = vpop.eup %2941 }
0x1d52   :  { %1811 = vrot.lane.b32.xlu0 %v2942_v13, %s3042_s6  ;;  %v2944_v15 = vpop.eup %2943 }
0x1d53   :  { %v1802_v14 = vadd.f32 1.0, %v2944_v15 }
0x1d55   :  { %2945 = vrcp.f32 %v1802_v14 }
0x1d5f   :  { %v2946_v26 = vpop.eup %2945 }
0x1d60   :  { %v1809_v28 = vmul.f32 %v2946_v26, %v1713_v58 }
0x1dc4   :  { %v1812_v16 = vpop.permute.xlu0 %1811 }
0x1dc5   :  { %v1814_v27 = vmul.f32 %v2946_v26, %v1812_v16 }
0x1dc7   :  { %1816 = vrot.lane.b32.xlu1 %v1814_v27, %s3042_s6 }
0x1e39   :  { %v1817_v19 = vpop.permute.xlu1 %1816 }
0x1e3a   :  { %v1819_v21 = vadd.f32 %v1817_v19, %v1809_v28 }
0x1e3c   :  { %2947 = vtanh.f32 %v1819_v21 }
0x1e3d   :  { %2949 = vpow2.f32 %v2370_v22 }
0x1e46   :  { %v2948_v55 = vpop.eup %2947 }
0x1e47   :  { %1822 = vrot.lane.b32.xlu0 %v2948_v55, %s3042_s6  ;;  %v2950_v23 = vpop.eup %2949  ;;  %v3043_v55 = vmov 0.0|0.0  }
0x1e48   :  { %v1803_v24 = vadd.f32 1.0, %v2950_v23  ;;  %2710 = vmatprep.subr.bf16.mxu0 %v3043_v55  ;;  %v2147_v23 = vld [vmem:[%s3637_s7 + $0x18] sm:$0xff] }
0x1e4a   :  { %2951 = vrcp.f32 %v1803_v24 }
0x1e54   :  { %v2952_v18 = vpop.eup %2951 }
0x1eb9   :  { %v1823_v25 = vpop.permute.xlu0 %1822 }
0x1eba   :  { %v1825_v49 = vmul.f32 %v2952_v18, %v1823_v25  ;;  %v2148_v18 = vld [vmem:[%s3637_s7 + $0x20] sm:$0xff]  ;;  %v2149_v25 = vld [vmem:[%s3637_s7 + $0x28] sm:$0xff] }
0x1ebc   :  { %2371 = vmatmul.mubr.msk.f32.vlgmr.msra.gmra.mrb[10].mxu1 %vm244_vm1, %v1825_v49  ;;  %v2717_v49 = vpack.c.bf16 %v2149_v25, %v2148_v18 }
0x1ebd   :  { %2681 = vmatpush1.bf16.msra.mxu1 %v3424_v61  ;;  %1999 = vmatprep.mubr.f32.mxu1 %v3041_v1 }
0x1ebe   :  { %2683 = vmatprep.subr.bf16.mxu1 %v3426_v62 }
0x1ec1   :  { %2685 = vmatpush1.bf16.msra.mxu1 %v3432_v7 }
0x1ec2   :  { %2687 = vmatprep.subr.bf16.mxu1 %v3435_v11 }
0x1ec5   :  { %2689 = vmatpush1.bf16.msra.mxu1 %v3441_v17 }
0x1ec6   :  { %2691 = vmatprep.subr.bf16.mxu1 %v3444_v20 }
0x1ec9   :  { %2693 = vmatpush1.bf16.msra.mxu1 %v3450_v31 }
0x1eca   :  { %2695 = vmatprep.subr.bf16.mxu1 %v3411_v54 }
0x1f8f   :  { %v1895_v9 = vpop.f32.mrb[10].mxu1 }
0x1f90   :  { %v1897_v29 = vpop.f32.mrb[11].mxu1  ;;  %v2751_v34 = vadd.f32 %v1895_v9, %v3491_v36  ;;  %v2150_v9 = vld [vmem:[%s3637_s7 + $0x30] sm:$0xff] }
0x1f91   :  { %v2752_v30 = vadd.f32 %v1897_v29, %v3485_v32  ;;  %v2151_v29 = vld [vmem:[%s3637_s7 + $0x38] sm:$0xff] }
0x1f92   :  { %v2372_v39 = vmul.f32 -1.442695, %v2751_v34 }
0x1f93   :  { %2953 = vtanh.f32 %v2752_v30  ;;  %v2373_v40 = vmul.f32 -1.442695, %v2752_v30  ;;  %v2720_v30 = vpack.c.bf16 %v2151_v29, %v2150_v9 }
0x1f94   :  { %2955 = vpow2.f32 %v2372_v39 }
0x1f9d   :  { %v2954_v33 = vpop.eup %2953 }
0x1f9e   :  { %1917 = vrot.lane.b32.xlu1 %v2954_v33, %s3042_s6  ;;  %v2956_v41 = vpop.eup %2955 }
0x1f9f   :  { %v1908_v42 = vadd.f32 1.0, %v2956_v41 }
0x1fa1   :  { %2957 = vrcp.f32 %v1908_v42 }
0x1fab   :  { %v2958_v43 = vpop.eup %2957 }
0x1fac   :  { %v1915_v54 = vmul.f32 %v2958_v43, %v1819_v21  ;;  %v2145_v21 = vld [vmem:[%s3637_s7 + $0x8] sm:$0xff] }
0x2010   :  { %v1918_v38 = vpop.permute.xlu1 %1917 }
0x2011   :  { %v1920_v44 = vmul.f32 %v2958_v43, %v1918_v38 }
0x2013   :  { %1922 = vrot.lane.b32.xlu0 %v1920_v44, %s3042_s6 }
0x2085   :  { %v1923_v47 = vpop.permute.xlu0 %1922 }
0x2086   :  { %v1925_v48 = vadd.f32 %v1923_v47, %v1915_v54 }
0x2088   :  { %2959 = vtanh.f32 %v1925_v48 }
0x2089   :  { %2961 = vpow2.f32 %v2373_v40 }
0x2092   :  { %v2960_v50 = vpop.eup %2959 }
0x2093   :  { %1928 = vrot.lane.b32.xlu1 %v2960_v50, %s3042_s6  ;;  %v2962_v51 = vpop.eup %2961  ;;  %v2236_v50 = vld [vmem:[%s3639_s9 + $0x8] sm:$0xff] }
0x2094   :  { %v1909_v37 = vadd.f32 1.0, %v2962_v51  ;;  %v2380_v51 = vld [vmem:[%s3638_s8] ss:$0 sm:$0xff] }
0x2096   :  { %2963 = vrcp.f32 %v1909_v37 }
0x20a0   :  { %v2964_v45 = vpop.eup %2963 }
0x2105   :  { %v1929_v52 = vpop.permute.xlu1 %1928 }
0x2106   :  { %v1931_v53 = vmul.f32 %v2964_v45, %v1929_v52 }
0x2108   :  { %2374 = vmatmul.mubr.msk.f32.vlgmr.msra.gmra.mrb[12].mxu1 %vm244_vm1, %v1931_v53 }
0x2109   :  { %2697 = vmatpush1.bf16.msra.mxu1 %v3424_v61  ;;  %2105 = vmatprep.mubr.f32.mxu1 %v3041_v1 }
0x210a   :  { %2699 = vmatprep.subr.bf16.mxu1 %v3426_v62 }
0x210d   :  { %2701 = vmatpush1.bf16.msra.mxu1 %v3432_v7 }
0x210e   :  { %2703 = vmatprep.subr.bf16.mxu1 %v3435_v11 }
0x2111   :  { %2705 = vmatpush1.bf16.msra.mxu1 %v3441_v17 }
0x2112   :  { %2707 = vmatprep.subr.bf16.mxu1 %v3444_v20 }
0x2115   :  { %2709 = vmatpush1.bf16.msra.mxu1 %v3450_v31 }
0x21db   :  { %v2001_v46 = vpop.f32.mrb[12].mxu1 }
0x21dc   :  { %v2003_v56 = vpop.f32.mrb[13].mxu1  ;;  %v2753_v62 = vadd.f32 %v2001_v46, %v3491_v36  ;;  %v2382_v46 = vld [vmem:[#allocation2] ss:$0 sm:$0xff] }
0x21dd   :  { %v2754_v57 = vadd.f32 %v2003_v56, %v3485_v32 }
0x21de   :  { %v2375_v35 = vmul.f32 -1.442695, %v2753_v62 }
0x21df   :  { %2965 = vtanh.f32 %v2754_v57  ;;  %v2376_v0 = vmul.f32 -1.442695, %v2754_v57 }
0x21e0   :  { %2967 = vpow2.f32 %v2375_v35 }
0x21e9   :  { %v2966_v61 = vpop.eup %2965 }
0x21ea   :  { %2023 = vrot.lane.b32.xlu0 %v2966_v61, %s3042_s6  ;;  %v2968_v7 = vpop.eup %2967 }
0x21eb   :  { %v2014_v11 = vadd.f32 1.0, %v2968_v7 }
0x21ed   :  { %2969 = vrcp.f32 %v2014_v11 }
0x21f7   :  { %v2970_v17 = vpop.eup %2969 }
0x21f8   :  { %v2021_v31 = vmul.f32 %v2970_v17, %v1925_v48  ;;  %v2235_v48 = vld [vmem:[%s3639_s9] sm:$0xff] }
0x21f9   :  { %v2723_v40 = vpack.c.bf16 %v2236_v50, %v2235_v48 }
0x225c   :  { %v2024_v58 = vpop.permute.xlu0 %2023 }
0x225d   :  { %v2026_v20 = vmul.f32 %v2970_v17, %v2024_v58 }
0x225f   :  { %2028 = vrot.lane.b32.xlu1 %v2026_v20, %s3042_s6 }
0x22d1   :  { %v2029_v59 = vpop.permute.xlu1 %2028 }
0x22d2   :  { %v2031_v60 = vadd.f32 %v2029_v59, %v2021_v31 }
0x22d4   :  { %2971 = vtanh.f32 %v2031_v60 }
0x22d5   :  { %2973 = vpow2.f32 %v2376_v0 }
0x22de   :  { %v2972_v8 = vpop.eup %2971 }
0x22df   :  { %2034 = vrot.lane.b32.xlu0 %v2972_v8, %s3042_s6  ;;  %v2974_v2 = vpop.eup %2973 }
0x22e0   :  { %v2015_v3 = vadd.f32 1.0, %v2974_v2 }
0x22e2   :  { %2975 = vrcp.f32 %v2015_v3 }
0x22ec   :  { %v2976_v4 = vpop.eup %2975 }
0x2351   :  { %v2035_v5 = vpop.permute.xlu0 %2034 }
0x2352   :  { %v2037_v6 = vmul.f32 %v2976_v4, %v2035_v5 }
0x2354   :  { %2377 = vmatmul.mubr.msk.f32.vlgmr.msra.gmra.mrb[14].mxu1 %vm244_vm1, %v2037_v6 }
0x2427   :  { %v2107_v12 = vpop.f32.mrb[14].mxu1 }
0x2428   :  { %v2109_v13 = vpop.f32.mrb[15].mxu1  ;;  %v2755_v15 = vadd.f32 %v2107_v12, %v3491_v36  ;;  %v2146_v36 = vld [vmem:[%s3637_s7 + $0x10] sm:$0xff] }
0x2429   :  { %v2756_v10 = vadd.f32 %v2109_v13, %v3485_v32  ;;  %v2144_v32 = vld [vmem:[%s3637_s7] sm:$0xff]  ;;  %v2714_v24 = vpack.c.bf16 %v2147_v23, %v2146_v36 }
0x242a   :  { %v2378_v14 = vmul.f32 -1.442695, %v2755_v15  ;;  %v2711_v22 = vpack.c.bf16 %v2145_v21, %v2144_v32 }
0x242b   :  { %2977 = vtanh.f32 %v2756_v10  ;;  %v2379_v42 = vmul.f32 -1.442695, %v2756_v10 }
0x242c   :  { %2979 = vpow2.f32 %v2378_v14  ;;  %2712 = vmatpush3.bf16.msra.mxu0 %v2711_v22 }
0x242d   :  { %2713 = vmatprep.subr.bf16.mxu0 %v3043_v55 }
0x2430   :  { %2715 = vmatpush3.bf16.msra.mxu0 %v2714_v24 }
0x2431   :  { %2716 = vmatprep.subr.bf16.mxu0 %v3043_v55 }
0x2434   :  { %2718 = vmatpush3.bf16.msra.mxu0 %v2717_v49 }
0x2435   :  { %v2978_v63 = vpop.eup %2977  ;;  %2719 = vmatprep.subr.bf16.mxu0 %v3043_v55 }
0x2436   :  { %2129 = vrot.lane.b32.xlu1 %v2978_v63, %s3042_s6  ;;  %v2980_v26 = vpop.eup %2979 }
0x2437   :  { %v2120_v16 = vadd.f32 1.0, %v2980_v26 }
0x2438   :  { %2721 = vmatpush3.bf16.msra.mxu0 %v2720_v30 }
0x2439   :  { %2981 = vrcp.f32 %v2120_v16  ;;  %2722 = vmatprep.subr.bf16.mxu0 %v3043_v55 }
0x2443   :  { %v2982_v27 = vpop.eup %2981 }
0x2444   :  { %v2127_v33 = vmul.f32 %v2982_v27, %v2031_v60 }
0x24a8   :  { %v2130_v28 = vpop.permute.xlu1 %2129 }
0x24a9   :  { %v2132_v19 = vmul.f32 %v2982_v27, %v2130_v28 }
0x24ab   :  { %2134 = vrot.lane.b32.xlu0 %v2132_v19, %s3042_s6 }
0x251d   :  { %v2135_v34 = vpop.permute.xlu0 %2134 }
0x251e   :  { %v2137_v39 = vadd.f32 %v2135_v34, %v2127_v33 }
0x2520   :  { %2983 = vtanh.f32 %v2137_v39 }
0x2521   :  { %2985 = vpow2.f32 %v2379_v42 }
0x252a   :  { %v2984_v41 = vpop.eup %2983 }
0x252b   :  { %2140 = vrot.lane.b32.xlu1 %v2984_v41, %s3042_s6  ;;  %v2986_v43 = vpop.eup %2985 }
0x252c   :  { %v2121_v38 = vadd.f32 1.0, %v2986_v43 }
0x252e   :  { %2987 = vrcp.f32 %v2121_v38 }
0x2538   :  { %v2988_v44 = vpop.eup %2987 }
0x259d   :  { %v2141_v54 = vpop.permute.xlu1 %2140 }
0x259e   :  { %v2143_v47 = vmul.f32 %v2988_v44, %v2141_v54 }
0x25a0   :  { %2413 = vmatmul.mubr.msk.f32.vlgmr.msra.gmra.mrb[16].mxu0 %vm244_vm1, %v2143_v47 }
0x25a1   :  { %2419 = vmatprep.mubr.msk.f32.mxu0 %vm3044_vm2, %v3041_v1  ;;  %2724 = vmatpush3.bf16.msra.mxu0 %v2723_v40 }
0x2673   :  { %v2228_v37 = vpop.f32.mrb[16].mxu0 }
0x2674   :  { %v2229_v45 = vadd.f32 %v2380_v51, %v2228_v37  ;;  %v2414_v52 = vpop.f32.mrb[17].mxu0 }
0x2676   :  { %vm2232_vm3 = vcmp.ge.f32.partialorder %v2229_v45, 0.0  ;;  %v2233_v53 = vmul.f32 0.2, %v2229_v45 }
0x2678   :  { %v2234_v1 = vsel %vm2232_vm3, %v2229_v45, %v2233_v53 }
0x2679   :  { %2420 = vmatmul.mubr.msk.f32.vlgmr.msra.gmra.mrb[18].mxu0 %vm2244_vm4, %v2234_v1 }
0x274c   :  { %v2314_v56 = vpop.f32.mrb[18].mxu0 }
0x274d   :  { %v2315_v57 = vadd.f32 %v2382_v46, %v2314_v56  ;;  %v2421_v61 = vpop.f32.mrb[19].mxu0 }
0x274f   :  { %2319 = vst.msk [vmem:[%s3641_s11] sm:$0xff] %vm2318_vm5, %v2315_v57 }
0x2750   :  { %2324 = vsyncpa [#allocation4], 1 }
0x2751   :  { %2325 = vsyncpa [#allocation6], 1 }

</bundles_post_ra>
